<compile_context>
chip_gen: v7x
topology: tpu7x:2x2x1
jax: 0.10.0
libtpu: 0.0.40
codegen_flags: <defaults>
</compile_context>

<pallas_src>
import functools

import jax
import jax.numpy as jnp
from jax.experimental import pallas as pl
from jax.experimental.pallas import tpu as pltpu


def molwise_kernel(pool_mean, scatter_dtype,
                   rbf_ref, x_ref, edge_mol_ref, inv_cnt_ref,
                   wr_ref, br_ref,
                   w0_ref, b0_ref,
                   w1_ref, b1_ref,
                   w2_ref, b2_ref,
                   wf_ref, bf_ref,
                   out_ref, acc_ref):
    pid = pl.program_id(0)
    G = acc_ref.shape[0]
    tE = x_ref.shape[0]

    @pl.when(pid == 0)
    def _():
        acc_ref[...] = jnp.zeros_like(acc_ref)

    # Per-edge filter: lin_rbf(rbf) * x                         (tE, C)
    rbf_filter = (jnp.dot(rbf_ref[...], wr_ref[...],
                          preferred_element_type=jnp.float32) + br_ref[...])
    edge_out = rbf_filter * x_ref[...]

    # Fused edge->molecule scatter_add as a one-hot MXU matmul.
    # onehot[g, e] = (g == edge_mol[e]); padded edges carry edge_mol == -1
    # so they never match any molecule row.
    onehot = (jax.lax.broadcasted_iota(jnp.int32, (G, tE), 0)
              == edge_mol_ref[...]).astype(scatter_dtype)          # (G, tE)
    acc_ref[...] += jnp.dot(onehot, edge_out.astype(scatter_dtype),
                            preferred_element_type=jnp.float32)    # (G, C)

    # Finalize once after all edge tiles have been accumulated.
    @pl.when(pid == pl.num_programs(0) - 1)
    def _():
        mol = acc_ref[...]
        if pool_mean:
            mol = mol * inv_cnt_ref[...]       # (G, 1) broadcast over C
        h = jax.nn.silu(jnp.dot(mol, w0_ref[...],
                                preferred_element_type=jnp.float32) + b0_ref[...])
        h = jax.nn.silu(jnp.dot(h, w1_ref[...],
                                preferred_element_type=jnp.float32) + b1_ref[...])
        h = jax.nn.silu(jnp.dot(h, w2_ref[...],
                                preferred_element_type=jnp.float32) + b2_ref[...])
        out_ref[...] = (jnp.dot(h, wf_ref[...],
                                preferred_element_type=jnp.float32) + bf_ref[...])


def _round_up(a, b):
    return ((a + b - 1) // b) * b


def molwise_forward(x, rbf, edge_index_0, atom_batch, num_atoms, dim_size,
                    params, pool_option='mean', edge_tile=512,
                    scatter_dtype=jnp.float32):
    assert pool_option in ('mean', 'add')
    E, C = x.shape
    R = rbf.shape[1]
    T = params['wf'].shape[0]
    G = dim_size

    # Fuse the two scatter stages: each edge scatters directly into its molecule.
    edge_mol = atom_batch.astype(jnp.int32)[edge_index_0.astype(jnp.int32)]

    # Per-molecule inverse atom counts (exact, computed once outside the kernel).
    if pool_option == 'mean':
        cnts = jax.ops.segment_sum(jnp.ones((num_atoms,), jnp.float32),
                                   atom_batch.astype(jnp.int32), num_segments=G)
        inv_cnt = 1.0 / jnp.maximum(cnts, 1.0)
    else:
        inv_cnt = jnp.ones((G,), jnp.float32)
    inv_cnt = inv_cnt.reshape(G, 1)

    # Edge tiling: one full tile if E fits, else 128-aligned streaming tiles.
    if E <= edge_tile:
        tE = _round_up(max(E, 8), 8)
    else:
        tE = _round_up(edge_tile, 128)
    Ep = _round_up(E, tE)
    pad = Ep - E
    x_p = jnp.pad(x.astype(jnp.float32), ((0, pad), (0, 0)))
    rbf_p = jnp.pad(rbf.astype(jnp.float32), ((0, pad), (0, 0)))
    edge_mol_p = jnp.pad(edge_mol, (0, pad), constant_values=-1).reshape(1, Ep)
    n_steps = Ep // tE

    args = (
        rbf_p, x_p, edge_mol_p, inv_cnt,
        params['wr'].T, params['br'].reshape(1, C),
        params['w0'].T, params['b0'].reshape(1, C),
        params['w1'].T, params['b1'].reshape(1, C),
        params['w2'].T, params['b2'].reshape(1, C),
        params['wf'].T, params['bf'].reshape(1, T),
    )

    def const(shape):
        return pl.BlockSpec(shape, lambda e: (0,) * len(shape))

    in_specs = [
        pl.BlockSpec((tE, R), lambda e: (e, 0)),     # rbf   (streamed)
        pl.BlockSpec((tE, C), lambda e: (e, 0)),     # x     (streamed)
        pl.BlockSpec((1, tE), lambda e: (0, e)),     # edge_mol (streamed)
        const((G, 1)),                               # inverse atom counts
        const((R, C)), const((1, C)),                # lin_rbf (resident)
        const((C, C)), const((1, C)),                # mlp 0
        const((C, C)), const((1, C)),                # mlp 1
        const((C, C)), const((1, C)),                # mlp 2
        const((C, T)), const((1, T)),                # final projection
    ]

    weight_bytes = 4 * (R * C + C + 3 * (C * C + C) + C * T + T)
    cost = pl.CostEstimate(
        flops=int(2 * Ep * R * C + Ep * C + 2 * G * Ep * C
                  + 3 * 2 * G * C * C + 2 * G * C * T),
        transcendentals=int(3 * G * C),
        bytes_accessed=int(4 * Ep * (C + R + 1) + weight_bytes + 4 * G * (T + 1)),
    )

    kernel = functools.partial(molwise_kernel, pool_option == 'mean',
                               scatter_dtype)
    return pl.pallas_call(
        kernel,
        out_shape=jax.ShapeDtypeStruct((G, T), jnp.float32),
        grid_spec=pltpu.PrefetchScalarGridSpec(
            num_scalar_prefetch=0,
            grid=(n_steps,),
            in_specs=in_specs,
            out_specs=pl.BlockSpec((G, T), lambda e: (0, 0)),
            scratch_shapes=[pltpu.VMEM((G, C), jnp.float32)],
        ),
        compiler_params=pltpu.CompilerParams(
            dimension_semantics=("arbitrary",)),
        cost_estimate=cost,
    )(*args)


def glorot_ortho(key, out_dim, in_dim):
    """Deterministic Glorot-scaled orthogonal init (DimeNet-style)."""
    w = jax.nn.initializers.orthogonal()(key, (out_dim, in_dim), jnp.float32)
    w = w * jnp.sqrt(2.0 / ((in_dim + out_dim) * jnp.var(w)))
    return w


def make_params(key, in_channels, rbf_dim, num_target, mlp_depth=3):
    ks = jax.random.split(key, mlp_depth + 2)
    params = {
        'wr': glorot_ortho(ks[0], in_channels, rbf_dim),
        'br': jnp.zeros((in_channels,), jnp.float32),
        'wf': glorot_ortho(ks[-1], num_target, in_channels),
        'bf': jnp.zeros((num_target,), jnp.float32),
    }
    for i in range(mlp_depth):
        params[f'w{i}'] = glorot_ortho(ks[i + 1], in_channels, in_channels)
        params[f'b{i}'] = jnp.zeros((in_channels,), jnp.float32)
    return params


def reference_forward(x, rbf, edge_index_0, atom_batch, num_atoms, dim_size,
                      params, pool_option='mean'):
    """Plain-JAX replica of the PyTorch module (two-stage scatter)."""
    rbf_filter = rbf @ params['wr'].T + params['br']
    out = rbf_filter * x
    out = jax.ops.segment_sum(out, edge_index_0, num_segments=num_atoms)
    if pool_option == 'mean':
        sums = jax.ops.segment_sum(out, atom_batch, num_segments=dim_size)
        cnts = jax.ops.segment_sum(jnp.ones((num_atoms, 1), jnp.float32),
                                   atom_batch, num_segments=dim_size)
        out = sums / jnp.maximum(cnts, 1.0)
    else:
        out = jax.ops.segment_sum(out, atom_batch, num_segments=dim_size)
    h = out
    for i in range(3):
        h = jax.nn.silu(h @ params[f'w{i}'].T + params[f'b{i}'])
    return h @ params['wf'].T + params['bf']


if __name__ == "__main__":
    # Keep kernel and reference matmuls on the same (full f32) precision path.
    jax.config.update("jax_default_matmul_precision", "highest")

    # Small, module-consistent shapes; edge_tile=128 exercises a 3-step grid.
    in_channels, rbf_dim, num_target = 64, 8, 1
    num_edges, num_atoms, dim_size = 300, 24, 3

    key = jax.random.PRNGKey(0)
    kp, kx, kr, ke, kb = jax.random.split(key, 5)

    params = make_params(kp, in_channels, rbf_dim, num_target)

    x = jax.random.normal(kx, (num_edges, in_channels), jnp.float32)
    rbf = jax.random.normal(kr, (num_edges, rbf_dim), jnp.float32)
    edge_index_0 = jax.random.randint(ke, (num_edges,), 0, num_atoms,
                                      dtype=jnp.int32)
    atom_batch = jnp.sort(jax.random.randint(kb, (num_atoms,), 0, dim_size,
                                             dtype=jnp.int32))

    ok = True
    for pool in ('mean', 'add'):
        out = molwise_forward(x, rbf, edge_index_0, atom_batch,
                              num_atoms, dim_size, params,
                              pool_option=pool, edge_tile=128)
        out = jax.block_until_ready(out)
        ref = reference_forward(x, rbf, edge_index_0, atom_batch,
                                num_atoms, dim_size, params, pool_option=pool)
        ok &= out.shape == (dim_size, num_target)
        ok &= bool(jnp.allclose(out, ref, rtol=2e-4, atol=2e-4))

    assert ok
    print("KERNEL_OK")
</pallas_src>

<mosaic_0001>
module attributes {stable_mosaic.version = 11 : i64} {
  func.func @molwise_kernel(%arg0: i32, %arg1: memref<128x8xf32, #tpu.memory_space<vmem>>, %arg2: memref<128x64xf32, #tpu.memory_space<vmem>>, %arg3: memref<1x128xi32, #tpu.memory_space<vmem>>, %arg4: memref<3x1xf32, #tpu.memory_space<vmem>>, %arg5: memref<8x64xf32, #tpu.memory_space<vmem>>, %arg6: memref<1x64xf32, #tpu.memory_space<vmem>>, %arg7: memref<64x64xf32, #tpu.memory_space<vmem>>, %arg8: memref<1x64xf32, #tpu.memory_space<vmem>>, %arg9: memref<64x64xf32, #tpu.memory_space<vmem>>, %arg10: memref<1x64xf32, #tpu.memory_space<vmem>>, %arg11: memref<64x64xf32, #tpu.memory_space<vmem>>, %arg12: memref<1x64xf32, #tpu.memory_space<vmem>>, %arg13: memref<64x1xf32, #tpu.memory_space<vmem>>, %arg14: memref<1x1xf32, #tpu.memory_space<vmem>>, %arg15: memref<3x1xf32, #tpu.memory_space<vmem>>, %arg16: memref<3x64xf32, #tpu.memory_space<vmem>>) attributes {dimension_semantics = [#tpu.dimension_semantics<arbitrary>], iteration_bounds = array<i64: 3>, scalar_prefetch = 0 : i64, scratch_operands = 1 : i64, tpu.core_type = #tpu.core_type<tc>, window_params = [{transform_indices = @transform_0, window_bounds = array<i64: 128, 8>}, {transform_indices = @transform_1, window_bounds = array<i64: 128, 64>}, {transform_indices = @transform_2, window_bounds = array<i64: 1, 128>}, {pipeline_mode = #tpu.pipeline_mode<synchronous>, transform_indices = @transform_3, window_bounds = array<i64: 3, 1>}, {pipeline_mode = #tpu.pipeline_mode<synchronous>, transform_indices = @transform_4, window_bounds = array<i64: 8, 64>}, {pipeline_mode = #tpu.pipeline_mode<synchronous>, transform_indices = @transform_5, window_bounds = array<i64: 1, 64>}, {pipeline_mode = #tpu.pipeline_mode<synchronous>, transform_indices = @transform_6, window_bounds = array<i64: 64, 64>}, {pipeline_mode = #tpu.pipeline_mode<synchronous>, transform_indices = @transform_7, window_bounds = array<i64: 1, 64>}, {pipeline_mode = #tpu.pipeline_mode<synchronous>, transform_indices = @transform_8, window_bounds = array<i64: 64, 64>}, {pipeline_mode = #tpu.pipeline_mode<synchronous>, transform_indices = @transform_9, window_bounds = array<i64: 1, 64>}, {pipeline_mode = #tpu.pipeline_mode<synchronous>, transform_indices = @transform_10, window_bounds = array<i64: 64, 64>}, {pipeline_mode = #tpu.pipeline_mode<synchronous>, transform_indices = @transform_11, window_bounds = array<i64: 1, 64>}, {pipeline_mode = #tpu.pipeline_mode<synchronous>, transform_indices = @transform_12, window_bounds = array<i64: 64, 1>}, {pipeline_mode = #tpu.pipeline_mode<synchronous>, transform_indices = @transform_13, window_bounds = array<i64: 1, 1>}, {pipeline_mode = #tpu.pipeline_mode<synchronous>, transform_indices = @transform_14, window_bounds = array<i64: 3, 1>}]} {
    %c0_i32 = arith.constant 0 : i32
    %0 = arith.cmpi eq, %arg0, %c0_i32 : i32
    %1 = arith.extui %0 : i1 to i32
    %c0_i32_0 = arith.constant 0 : i32
    %2 = arith.cmpi ne, %1, %c0_i32_0 : i32
    scf.if %2 {
      %cst_16 = arith.constant 0.000000e+00 : f32
      %24 = vector.broadcast %cst_16 : f32 to vector<3x64xf32>
      %c0_17 = arith.constant 0 : index
      %c0_18 = arith.constant 0 : index
      %25 = vector.load %arg16[%c0_17, %c0_18] : memref<3x64xf32, #tpu.memory_space<vmem>>, vector<3x64xf32>
      tpu.vector_store %arg16[%c0_17, %c0_18], %24 {strides = array<i32>} : memref<3x64xf32, #tpu.memory_space<vmem>>, vector<3x64xf32>,
    } else {
    }
    %c0 = arith.constant 0 : index
    %c0_1 = arith.constant 0 : index
    %3 = vector.load %arg1[%c0, %c0_1] : memref<128x8xf32, #tpu.memory_space<vmem>>, vector<128x8xf32>
    %c0_2 = arith.constant 0 : index
    %c0_3 = arith.constant 0 : index
    %4 = vector.load %arg5[%c0_2, %c0_3] : memref<8x64xf32, #tpu.memory_space<vmem>>, vector<8x64xf32>
    %cst = arith.constant dense<0.000000e+00> : vector<128x64xf32>
    %5 = tpu.matmul %3, %4, %cst {dimension_numbers = #tpu.dot_dimension_numbers<[1], [0], [0], [1], [0, 0, 1, 1], [], []>, precision = #tpu.contract_precision<fp32>} : vector<128x8xf32>, vector<8x64xf32>, vector<128x64xf32> -> vector<128x64xf32>
    %c0_4 = arith.constant 0 : index
    %c0_5 = arith.constant 0 : index
    %6 = vector.load %arg6[%c0_4, %c0_5] : memref<1x64xf32, #tpu.memory_space<vmem>>, vector<1x64xf32>
    %7 = vector.broadcast %6 : vector<1x64xf32> to vector<128x64xf32>
    %8 = arith.addf %5, %7 : vector<128x64xf32>
    %c0_6 = arith.constant 0 : index
    %c0_7 = arith.constant 0 : index
    %9 = vector.load %arg2[%c0_6, %c0_7] : memref<128x64xf32, #tpu.memory_space<vmem>>, vector<128x64xf32>
    %10 = arith.mulf %8, %9 : vector<128x64xf32>
    %11 = tpu.iota {dimensions = array<i32: 0>} : vector<3x128xi32>
    %c0_8 = arith.constant 0 : index
    %c0_9 = arith.constant 0 : index
    %12 = vector.load %arg3[%c0_8, %c0_9] : memref<1x128xi32, #tpu.memory_space<vmem>>, vector<1x128xi32>
    %13 = vector.broadcast %12 : vector<1x128xi32> to vector<3x128xi32>
    %14 = arith.cmpi eq, %11, %13 : vector<3x128xi32>
    %15 = arith.extui %14 : vector<3x128xi1> to vector<3x128xi32>
    %16 = arith.sitofp %15 : vector<3x128xi32> to vector<3x128xf32>
    %c0_10 = arith.constant 0 : index
    %c0_11 = arith.constant 0 : index
    %17 = vector.load %arg16[%c0_10, %c0_11] : memref<3x64xf32, #tpu.memory_space<vmem>>, vector<3x64xf32>
    %cst_12 = arith.constant dense<0.000000e+00> : vector<3x64xf32>
    %18 = tpu.matmul %16, %10, %cst_12 {dimension_numbers = #tpu.dot_dimension_numbers<[1], [0], [0], [1], [0, 0, 1, 1], [], []>, precision = #tpu.contract_precision<fp32>} : vector<3x128xf32>, vector<128x64xf32>, vector<3x64xf32> -> vector<3x64xf32>
    %19 = arith.addf %17, %18 : vector<3x64xf32>
    %c0_13 = arith.constant 0 : index
    %c0_14 = arith.constant 0 : index
    %20 = vector.load %arg16[%c0_13, %c0_14] : memref<3x64xf32, #tpu.memory_space<vmem>>, vector<3x64xf32>
    tpu.vector_store %arg16[%c0_13, %c0_14], %19 {strides = array<i32>} : memref<3x64xf32, #tpu.memory_space<vmem>>, vector<3x64xf32>,
    %c2_i32 = arith.constant 2 : i32
    %21 = arith.cmpi eq, %arg0, %c2_i32 : i32
    %22 = arith.extui %21 : i1 to i32
    %c0_i32_15 = arith.constant 0 : i32
    %23 = arith.cmpi ne, %22, %c0_i32_15 : i32
    scf.if %23 {
      %c0_16 = arith.constant 0 : index
      %c0_17 = arith.constant 0 : index
      %24 = vector.load %arg16[%c0_16, %c0_17] : memref<3x64xf32, #tpu.memory_space<vmem>>, vector<3x64xf32>
      %c0_18 = arith.constant 0 : index
      %c0_19 = arith.constant 0 : index
      %25 = vector.load %arg4[%c0_18, %c0_19] : memref<3x1xf32, #tpu.memory_space<vmem>>, vector<3x1xf32>
      %26 = vector.broadcast %25 : vector<3x1xf32> to vector<3x64xf32>
      %27 = arith.mulf %24, %26 : vector<3x64xf32>
      %c0_20 = arith.constant 0 : index
      %c0_21 = arith.constant 0 : index
      %28 = vector.load %arg7[%c0_20, %c0_21] : memref<64x64xf32, #tpu.memory_space<vmem>>, vector<64x64xf32>
      %cst_22 = arith.constant dense<0.000000e+00> : vector<3x64xf32>
      %29 = tpu.matmul %27, %28, %cst_22 {dimension_numbers = #tpu.dot_dimension_numbers<[1], [0], [0], [1], [0, 0, 1, 1], [], []>, precision = #tpu.contract_precision<fp32>} : vector<3x64xf32>, vector<64x64xf32>, vector<3x64xf32> -> vector<3x64xf32>
      %c0_23 = arith.constant 0 : index
      %c0_24 = arith.constant 0 : index
      %30 = vector.load %arg8[%c0_23, %c0_24] : memref<1x64xf32, #tpu.memory_space<vmem>>, vector<1x64xf32>
      %31 = vector.broadcast %30 : vector<1x64xf32> to vector<3x64xf32>
      %32 = arith.addf %29, %31 : vector<3x64xf32>
      %33 = arith.negf %32 : vector<3x64xf32>
      %34 = math.exp %33 : vector<3x64xf32>
      %cst_25 = arith.constant 1.000000e+00 : f32
      %35 = vector.broadcast %cst_25 : f32 to vector<3x64xf32>
      %36 = arith.addf %35, %34 : vector<3x64xf32>
      %37 = arith.divf %35, %36 : vector<3x64xf32>
      %38 = arith.mulf %32, %37 : vector<3x64xf32>
      %c0_26 = arith.constant 0 : index
      %c0_27 = arith.constant 0 : index
      %39 = vector.load %arg9[%c0_26, %c0_27] : memref<64x64xf32, #tpu.memory_space<vmem>>, vector<64x64xf32>
      %cst_28 = arith.constant dense<0.000000e+00> : vector<3x64xf32>
      %40 = tpu.matmul %38, %39, %cst_28 {dimension_numbers = #tpu.dot_dimension_numbers<[1], [0], [0], [1], [0, 0, 1, 1], [], []>, precision = #tpu.contract_precision<fp32>} : vector<3x64xf32>, vector<64x64xf32>, vector<3x64xf32> -> vector<3x64xf32>
      %c0_29 = arith.constant 0 : index
      %c0_30 = arith.constant 0 : index
      %41 = vector.load %arg10[%c0_29, %c0_30] : memref<1x64xf32, #tpu.memory_space<vmem>>, vector<1x64xf32>
      %42 = vector.broadcast %41 : vector<1x64xf32> to vector<3x64xf32>
      %43 = arith.addf %40, %42 : vector<3x64xf32>
      %44 = arith.negf %43 : vector<3x64xf32>
      %45 = math.exp %44 : vector<3x64xf32>
      %cst_31 = arith.constant 1.000000e+00 : f32
      %46 = vector.broadcast %cst_31 : f32 to vector<3x64xf32>
      %47 = arith.addf %46, %45 : vector<3x64xf32>
      %48 = arith.divf %46, %47 : vector<3x64xf32>
      %49 = arith.mulf %43, %48 : vector<3x64xf32>
      %c0_32 = arith.constant 0 : index
      %c0_33 = arith.constant 0 : index
      %50 = vector.load %arg11[%c0_32, %c0_33] : memref<64x64xf32, #tpu.memory_space<vmem>>, vector<64x64xf32>
      %cst_34 = arith.constant dense<0.000000e+00> : vector<3x64xf32>
      %51 = tpu.matmul %49, %50, %cst_34 {dimension_numbers = #tpu.dot_dimension_numbers<[1], [0], [0], [1], [0, 0, 1, 1], [], []>, precision = #tpu.contract_precision<fp32>} : vector<3x64xf32>, vector<64x64xf32>, vector<3x64xf32> -> vector<3x64xf32>
      %c0_35 = arith.constant 0 : index
      %c0_36 = arith.constant 0 : index
      %52 = vector.load %arg12[%c0_35, %c0_36] : memref<1x64xf32, #tpu.memory_space<vmem>>, vector<1x64xf32>
      %53 = vector.broadcast %52 : vector<1x64xf32> to vector<3x64xf32>
      %54 = arith.addf %51, %53 : vector<3x64xf32>
      %55 = arith.negf %54 : vector<3x64xf32>
      %56 = math.exp %55 : vector<3x64xf32>
      %cst_37 = arith.constant 1.000000e+00 : f32
      %57 = vector.broadcast %cst_37 : f32 to vector<3x64xf32>
      %58 = arith.addf %57, %56 : vector<3x64xf32>
      %59 = arith.divf %57, %58 : vector<3x64xf32>
      %60 = arith.mulf %54, %59 : vector<3x64xf32>
      %c0_38 = arith.constant 0 : index
      %c0_39 = arith.constant 0 : index
      %61 = vector.load %arg13[%c0_38, %c0_39] : memref<64x1xf32, #tpu.memory_space<vmem>>, vector<64x1xf32>
      %cst_40 = arith.constant dense<0.000000e+00> : vector<3x1xf32>
      %62 = tpu.matmul %60, %61, %cst_40 {dimension_numbers = #tpu.dot_dimension_numbers<[1], [0], [0], [1], [0, 0, 1, 1], [], []>, precision = #tpu.contract_precision<fp32>} : vector<3x64xf32>, vector<64x1xf32>, vector<3x1xf32> -> vector<3x1xf32>
      %c0_41 = arith.constant 0 : index
      %c0_42 = arith.constant 0 : index
      %63 = vector.load %arg14[%c0_41, %c0_42] : memref<1x1xf32, #tpu.memory_space<vmem>>, vector<1x1xf32>
      %64 = vector.broadcast %63 : vector<1x1xf32> to vector<3x1xf32>
      %65 = arith.addf %62, %64 : vector<3x1xf32>
      %c0_43 = arith.constant 0 : index
      %c0_44 = arith.constant 0 : index
      %66 = vector.load %arg15[%c0_43, %c0_44] : memref<3x1xf32, #tpu.memory_space<vmem>>, vector<3x1xf32>
      tpu.vector_store %arg15[%c0_43, %c0_44], %65 {strides = array<i32>} : memref<3x1xf32, #tpu.memory_space<vmem>>, vector<3x1xf32>,
    } else {
    }
    return
  }
  func.func @transform_0(%arg0: i32) -> (i32, i32) {
    %c0_i32 = arith.constant 0 : i32
    %c0_i32_0 = arith.constant 0 : i32
    return %arg0, %c0_i32 : i32, i32
  }
  func.func @transform_1(%arg0: i32) -> (i32, i32) {
    %c0_i32 = arith.constant 0 : i32
    %c0_i32_0 = arith.constant 0 : i32
    return %arg0, %c0_i32 : i32, i32
  }
  func.func @transform_2(%arg0: i32) -> (i32, i32) {
    %c0_i32 = arith.constant 0 : i32
    %c0_i32_0 = arith.constant 0 : i32
    return %c0_i32, %arg0 : i32, i32
  }
  func.func @transform_3(%arg0: i32) -> (i32, i32) {
    %c0_i32 = arith.constant 0 : i32
    %c0_i32_0 = arith.constant 0 : i32
    %c0_i32_1 = arith.constant 0 : i32
    return %c0_i32, %c0_i32_0 : i32, i32
  }
  func.func @transform_4(%arg0: i32) -> (i32, i32) {
    %c0_i32 = arith.constant 0 : i32
    %c0_i32_0 = arith.constant 0 : i32
    %c0_i32_1 = arith.constant 0 : i32
    return %c0_i32, %c0_i32_0 : i32, i32
  }
  func.func @transform_5(%arg0: i32) -> (i32, i32) {
    %c0_i32 = arith.constant 0 : i32
    %c0_i32_0 = arith.constant 0 : i32
    %c0_i32_1 = arith.constant 0 : i32
    return %c0_i32, %c0_i32_0 : i32, i32
  }
  func.func @transform_6(%arg0: i32) -> (i32, i32) {
    %c0_i32 = arith.constant 0 : i32
    %c0_i32_0 = arith.constant 0 : i32
    %c0_i32_1 = arith.constant 0 : i32
    return %c0_i32, %c0_i32_0 : i32, i32
  }
  func.func @transform_7(%arg0: i32) -> (i32, i32) {
    %c0_i32 = arith.constant 0 : i32
    %c0_i32_0 = arith.constant 0 : i32
    %c0_i32_1 = arith.constant 0 : i32
    return %c0_i32, %c0_i32_0 : i32, i32
  }
  func.func @transform_8(%arg0: i32) -> (i32, i32) {
    %c0_i32 = arith.constant 0 : i32
    %c0_i32_0 = arith.constant 0 : i32
    %c0_i32_1 = arith.constant 0 : i32
    return %c0_i32, %c0_i32_0 : i32, i32
  }
  func.func @transform_9(%arg0: i32) -> (i32, i32) {
    %c0_i32 = arith.constant 0 : i32
    %c0_i32_0 = arith.constant 0 : i32
    %c0_i32_1 = arith.constant 0 : i32
    return %c0_i32, %c0_i32_0 : i32, i32
  }
  func.func @transform_10(%arg0: i32) -> (i32, i32) {
    %c0_i32 = arith.constant 0 : i32
    %c0_i32_0 = arith.constant 0 : i32
    %c0_i32_1 = arith.constant 0 : i32
    return %c0_i32, %c0_i32_0 : i32, i32
  }
  func.func @transform_11(%arg0: i32) -> (i32, i32) {
    %c0_i32 = arith.constant 0 : i32
    %c0_i32_0 = arith.constant 0 : i32
    %c0_i32_1 = arith.constant 0 : i32
    return %c0_i32, %c0_i32_0 : i32, i32
  }
  func.func @transform_12(%arg0: i32) -> (i32, i32) {
    %c0_i32 = arith.constant 0 : i32
    %c0_i32_0 = arith.constant 0 : i32
    %c0_i32_1 = arith.constant 0 : i32
    return %c0_i32, %c0_i32_0 : i32, i32
  }
  func.func @transform_13(%arg0: i32) -> (i32, i32) {
    %c0_i32 = arith.constant 0 : i32
    %c0_i32_0 = arith.constant 0 : i32
    %c0_i32_1 = arith.constant 0 : i32
    return %c0_i32, %c0_i32_0 : i32, i32
  }
  func.func @transform_14(%arg0: i32) -> (i32, i32) {
    %c0_i32 = arith.constant 0 : i32
    %c0_i32_0 = arith.constant 0 : i32
    %c0_i32_1 = arith.constant 0 : i32
    return %c0_i32, %c0_i32_0 : i32, i32
  }
}

</mosaic_0001>

<bundles_post_ra>
// kernel: tpu_custom_call.1
= control target key start
LH: loop header
LB: loop body
LE: loop exit
PB: predicated region body
PF: predicated region fallthrough
CT: control target
= control target key end

     0   :  { %s6619_s15 = smov 0   ;;  %s7782_s0 = inlined_call_operand.vmem [shape: f32[384,8], index: 0, kind: input, shape index: {}]   ;;  %s7783_s1 = inlined_call_operand.vmem [shape: f32[384,64], index: 1, kind: input, shape index: {}]   ;;  %s7784_s2 = inlined_call_operand.vmem [shape: s32[1,384], index: 2, kind: input, shape index: {}]   ;;  %s7785_s3 = inlined_call_operand.vmem [shape: f32[3,1], index: 3, kind: input, shape index: {}]   ;;  %s7786_s4 = inlined_call_operand.vmem [shape: f32[8,64], index: 4, kind: input, shape index: {}]   ;;  %s7787_s5 = inlined_call_operand.vmem [shape: f32[1,64], index: 5, kind: input, shape index: {}]   ;;  %s7788_s6 = inlined_call_operand.vmem [shape: f32[64,64], index: 6, kind: input, shape index: {}]   ;;  %s7789_s7 = inlined_call_operand.vmem [shape: f32[1,64], index: 7, kind: input, shape index: {}]   ;;  %s7790_s8 = inlined_call_operand.vmem [shape: f32[64,64], index: 8, kind: input, shape index: {}]   ;;  %s7791_s9 = inlined_call_operand.vmem [shape: f32[1,64], index: 9, kind: input, shape index: {}]   ;;  %s7792_s10 = inlined_call_operand.vmem [shape: f32[64,64], index: 10, kind: input, shape index: {}]   ;;  %s7793_s11 = inlined_call_operand.vmem [shape: f32[1,64], index: 11, kind: input, shape index: {}]   ;;  %s7794_s12 = inlined_call_operand.vmem [shape: f32[64,1], index: 12, kind: input, shape index: {}]   ;;  %s7795_s13 = inlined_call_operand.<no memory space> [shape: f32[1,1], index: 13, kind: input, shape index: {}]   ;;  %s7796_s14 = inlined_call_operand.vmem [shape: f32[3,1], index: 14, kind: output, shape index: {}]  }
   0x1   :  { %v19_v0 = vstv %s7795_s13 }
   0x2   :  { %20 = vst [vmem:[#allocation3] sm:$0x1] %v19_v0 }
   0x3 LB: > { %s6625_s16 = sadd.s32 4294967295, %s6530_s15   ;;  %p4658_p0 = scmp.ge.s32.totalorder %s6530_s15, 1  ;;  %s6530_s15 = sphi %s6619_s15, %s26_s15  }
   0x4   : > { %p429_p1 = scmp.lt.s32.totalorder %s6530_s15, 4 }
   0x6   : > { %p430_p2 = pnand %p4658_p0, %p429_p1 }
   0x7   : > { %s4659_s13 = sshll.u32 (!%p430_p2), %s6625_s16, 4  ;;  %p490_p3 = scmp.lt.s32.totalorder (!%p430_p2), %s6625_s16, 2 }
   0x8   : > { %433 = sbr.rel (%p430_p2) target bundleno = 2142 (0x85e), region = 76  ;;  %p479_p4 = scmp.lt.s32.totalorder (!%p430_p2), %s4659_s13, 47 }
   0x9   : > { %p4663_p5 = scmp.ne.s32.totalorder (!%p430_p2), %s6625_s16, 0 }
   0xf   : > { %s6632_s17 = scalar_select %p490_p3, %s6625_s16, 2 }
  0x10   : > { %s7810_s13 = smov (!%p479_p4, %s4659_s13), 47  ;;  %496 = sbr.rel (%p4663_p5) target bundleno = 23 (0x17), region = 80 }
  0x11   : > { %s492_s20 = scalar_lea.vmem %s7784_s2, %s6632_s17  ;;  %s4660_s21 = sshll.u32 %s7810_s13, 3  ;;  %vm497_vm0 = vcmask (!%p4663_p5), 518144   ;;  %v6532_v1 = vmov (!%p4663_p5), 0.0  }
  0x12   : > { %s6641_s24 = scalar_lea.vmem %s7782_s0, %s4660_s21  ;;  %s6646_s27 = scalar_lea.vmem %s7783_s1, %s4660_s21  ;;  %498 = vst.msk [vmem:[#allocation2] sm:$0x7] (!%p4663_p5), %vm497_vm0, %v6532_v1 }
  0x17 PF: > { %v515_v2 = vld [vmem:[%s7786_s4] sm:$0xff]  ;;  %vm523_vm1 = vcmask 64512   ;;  %v500_v4 = vld [vmem:[%s6641_s24 + $0x8] sm:$0xff]  ;;  %v501_v8 = vld [vmem:[%s6641_s24 + $0x10] sm:$0xff]  ;;  %vm6534_vm2 = vmmov 0   ;;  %vm2348_vm4 = vcmask 518144  }
  0x18   : > { %v499_v3 = vld [vmem:[%s6641_s24] sm:$0xff]  ;;  %v6654_v5 = vand.u32 4294901760, %v515_v2  ;;  %v528_v7 = vsel %vm523_vm1, %v500_v4, 0  ;;  %v502_v9 = vld [vmem:[%s6641_s24 + $0x18] sm:$0xff]  ;;  %v531_v13 = vsel %vm523_vm1, %v501_v8, 0  ;;  %v504_v15 = vld [vmem:[%s6641_s24 + $0x28] sm:$0xff] }
  0x19   : > { %v525_v6 = vsel %vm523_vm1, %v499_v3, 0  ;;  %v503_v10 = vld [vmem:[%s6641_s24 + $0x20] sm:$0xff]  ;;  %v6663_v12 = vand.u32 4294901760, %v528_v7  ;;  %v534_v14 = vsel %vm523_vm1, %v502_v9, 0  ;;  %v6672_v17 = vand.u32 4294901760, %v531_v13  ;;  %v505_v20 = vld [vmem:[%s6641_s24 + $0x30] sm:$0xff] }
  0x1a   : > { %v6661_v11 = vand.u32 4294901760, %v525_v6  ;;  %5100 = vmatprep.subr.mxu0 %v6654_v5  ;;  %v6670_v16 = vsub.f32 %v515_v2, %v6654_v5  ;;  %v6674_v18 = vand.u32 4294901760, %v534_v14  ;;  %v537_v19 = vsel %vm523_vm1, %v503_v10, 0  ;;  %v506_v41 = vld [vmem:[%s6641_s24 + $0x38] sm:$0xff]  ;;  %v507_v46 = vld [vmem:[%s6641_s24 + $0x40] sm:$0xff]  ;;  %v508_v51 = vld [vmem:[%s6641_s24 + $0x48] sm:$0xff] }
  0x1b   : > { %5101 = vmatpush3.msra.mxu0 %v6654_v5  ;;  %v6683_v22 = vsub.f32 %v528_v7, %v6663_v12  ;;  %v6685_v23 = vand.u32 4294901760, %v537_v19  ;;  %v540_v24 = vsel %vm523_vm1, %v504_v15, 0  ;;  %v6692_v26 = vsub.f32 %v531_v13, %v6672_v17  ;;  %v509_v52 = vld [vmem:[%s6641_s24 + $0x50] sm:$0xff]  ;;  %v510_v57 = vld [vmem:[%s6641_s24 + $0x58] sm:$0xff]  ;;  %v511_v62 = vld [vmem:[%s6641_s24 + $0x60] sm:$0xff]  ;;  %p4670_p6 = scmp.ne.s32.totalorder %s6625_s16, 2 }
  0x1c   : > { %v6680_v21 = vsub.f32 %v525_v6, %v6661_v11  ;;  %v6689_v25 = vand.u32 4294901760, %v6670_v16  ;;  %v6695_v27 = vsub.f32 %v534_v14, %v6674_v18  ;;  %v6697_v28 = vand.u32 4294901760, %v540_v24  ;;  %v512_v63 = vld [vmem:[%s6641_s24 + $0x68] sm:$0xff]  ;;  %v513_v15 = vld [vmem:[%s6641_s24 + $0x70] sm:$0xff] }
  0x1d   : > { %v650_v30 = vand.u32 4294901760, %v6683_v22  ;;  %v6702_v31 = vsub.f32 %v537_v19, %v6685_v23  ;;  %v543_v32 = vsel %vm523_vm1, %v505_v20, 0  ;;  %v660_v34 = vand.u32 4294901760, %v6692_v26 }
  0x1e   : > { %v640_v29 = vand.u32 4294901760, %v6680_v21  ;;  %v802_v33 = vsub.f32 %v6670_v16, %v6689_v25  ;;  %v670_v35 = vand.u32 4294901760, %v6695_v27  ;;  %v6710_v36 = vsub.f32 %v540_v24, %v6697_v28 }
  0x1f   : > { %v651_v38 = vsub.f32 %v6683_v22, %v650_v30  ;;  %v680_v39 = vand.u32 4294901760, %v6702_v31  ;;  %v6719_v40 = vand.u32 4294901760, %v543_v32  ;;  %v661_v43 = vsub.f32 %v6692_v26, %v660_v34 }
  0x20   : > { %v641_v37 = vsub.f32 %v6680_v21, %v640_v29  ;;  %v803_v42 = vand.u32 4294901760, %v802_v33  ;;  %v671_v44 = vsub.f32 %v6695_v27, %v670_v35  ;;  %v690_v45 = vand.u32 4294901760, %v6710_v36 }
  0x21   : > { %v652_v48 = vand.u32 4294901760, %v651_v38  ;;  %v681_v49 = vsub.f32 %v6702_v31, %v680_v39  ;;  %v6734_v50 = vsub.f32 %v543_v32, %v6719_v40  ;;  %v662_v53 = vand.u32 4294901760, %v661_v43 }
  0x22   : > { %v642_v47 = vand.u32 4294901760, %v641_v37  ;;  %5126 = vmatprep.subr.mxu0 %v803_v42  ;;  %v672_v54 = vand.u32 4294901760, %v671_v44  ;;  %v691_v55 = vsub.f32 %v6710_v36, %v690_v45  ;;  %v546_v56 = vsel %vm523_vm1, %v506_v41, 0 }
  0x23   : > { %v682_v58 = vand.u32 4294901760, %v681_v49  ;;  %v700_v59 = vand.u32 4294901760, %v6734_v50  ;;  %v6744_v60 = vand.u32 4294901760, %v546_v56  ;;  %v549_v61 = vsel %vm523_vm1, %v507_v46, 0 }
  0x24   : > { %5102 = vmatprep.mubr.f32.mxu0 %v642_v47  ;;  %v692_v0 = vand.u32 4294901760, %v691_v55  ;;  %v6749_v1 = vand.u32 4294901760, %v549_v61  ;;  %v552_v2 = vsel %vm523_vm1, %v508_v51, 0  ;;  %v555_v3 = vsel %vm523_vm1, %v509_v52, 0  ;;  %v514_v51 = vld [vmem:[%s6641_s24 + $0x78] sm:$0xff] }
  0x25   : > { %5103 = vmatmul.mubr.f32.vlgmr.msra.gmra.mrb[0].mxu0 %v652_v48  ;;  %v701_v4 = vsub.f32 %v6734_v50, %v700_v59  ;;  %v6757_v6 = vsub.f32 %v546_v56, %v6744_v60  ;;  %v6759_v7 = vand.u32 4294901760, %v552_v2  ;;  %v6761_v8 = vand.u32 4294901760, %v555_v3 }
  0x26   : > { %5127 = vmatpush3.msra.mxu0 %v803_v42  ;;  %5105 = vmatprep.mubr.f32.mxu0 %v662_v53  ;;  %v6764_v9 = vsub.f32 %v549_v61, %v6749_v1  ;;  %v558_v10 = vsel %vm523_vm1, %v510_v57, 0  ;;  %v561_v13 = vsel %vm523_vm1, %v511_v62, 0  ;;  %v564_v14 = vsel %vm523_vm1, %v512_v63, 0 }
  0x27   : > { %5152 = vmatprep.subr.mxu0 %v6670_v16  ;;  %v702_v19 = vand.u32 4294901760, %v701_v4  ;;  %v710_v20 = vand.u32 4294901760, %v6757_v6  ;;  %v6773_v24 = vsub.f32 %v552_v2, %v6759_v7  ;;  %v6776_v32 = vsub.f32 %v555_v3, %v6761_v8 }
  0x28   : > { %v720_v33 = vand.u32 4294901760, %v6764_v9  ;;  %v6779_v37 = vand.u32 4294901760, %v558_v10  ;;  %v6781_v38 = vand.u32 4294901760, %v561_v13  ;;  %v6783_v41 = vand.u32 4294901760, %v564_v14 }
  0x29   : > { %5106 = vmatmul.mubr.f32.gmra.mrb[2].mxu0 %v672_v54  ;;  %v711_v42 = vsub.f32 %v6757_v6, %v710_v20  ;;  %v730_v43 = vand.u32 4294901760, %v6773_v24  ;;  %v740_v44 = vand.u32 4294901760, %v6776_v32  ;;  %v567_v46 = vsel %vm523_vm1, %v513_v15, 0 }
  0x2a   : > { %5108 = vmatprep.mubr.f32.mxu0 %v682_v58  ;;  %v721_v47 = vsub.f32 %v6764_v9, %v720_v33  ;;  %v6795_v48 = vsub.f32 %v558_v10, %v6779_v37  ;;  %v6798_v49 = vsub.f32 %v561_v13, %v6781_v38  ;;  %v6802_v52 = vsub.f32 %v564_v14, %v6783_v41 }
  0x2b   : > { %v6804_v53 = vand.u32 4294901760, %v567_v46  ;;  %v712_v54 = vand.u32 4294901760, %v711_v42  ;;  %v731_v55 = vsub.f32 %v6773_v24, %v730_v43  ;;  %v741_v56 = vsub.f32 %v6776_v32, %v740_v44 }
  0x2c   : > { %v750_v57 = vand.u32 4294901760, %v6795_v48  ;;  %v722_v58 = vand.u32 4294901760, %v721_v47  ;;  %v760_v61 = vand.u32 4294901760, %v6798_v49  ;;  %v570_v63 = vsel %vm523_vm1, %v514_v51, 0 }
  0x2d   : > { %5109 = vmatmul.mubr.f32.gmra.mrb[4].mxu0 %v692_v0  ;;  %v6815_v62 = vsub.f32 %v567_v46, %v6804_v53  ;;  %v6818_v0 = vand.u32 4294901760, %v570_v63  ;;  %v732_v2 = vand.u32 4294901760, %v731_v55  ;;  %v770_v4 = vand.u32 4294901760, %v6802_v52 }
  0x2e   : > { %5111 = vmatprep.mubr.f32.mxu0 %v702_v19  ;;  %v751_v3 = vsub.f32 %v6795_v48, %v750_v57  ;;  %v742_v13 = vand.u32 4294901760, %v741_v56  ;;  %v761_v14 = vsub.f32 %v6798_v49, %v760_v61  ;;  %vm6539_vm5 = vmmov (!%p4670_p6), 0  }
  0x2f   : > { %v6825_v10 = vsub.f32 %v570_v63, %v6818_v0  ;;  %v780_v15 = vand.u32 4294901760, %v6815_v62  ;;  %v771_v42 = vsub.f32 %v6802_v52, %v770_v4  ;;  %vm2377_vm6 = vcmask (!%p4670_p6), 523264  }
  0x30   : > { %v752_v19 = vand.u32 4294901760, %v751_v3  ;;  %v762_v47 = vand.u32 4294901760, %v761_v14  ;;  %vm4604_vm7 = vcmask (!%p4670_p6), 2048  }
  0x31   : > { %5112 = vmatmul.mubr.f32.gmra.mrb[6].mxu0 %v712_v54  ;;  %v790_v46 = vand.u32 4294901760, %v6825_v10  ;;  %v781_v51 = vsub.f32 %v6815_v62, %v780_v15  ;;  %v772_v54 = vand.u32 4294901760, %v771_v42  ;;  %v1669_v42 = vld [vmem:[%s6646_s27 + $0x30] sm:$0xff] }
  0x32   : > { %5114 = vmatprep.mubr.f32.mxu0 %v722_v58 }
  0x33   : > { %v791_v55 = vsub.f32 %v6825_v10, %v790_v46  ;;  %v782_v56 = vand.u32 4294901760, %v781_v51 }
  0x35   : > { %5115 = vmatmul.mubr.f32.gmra.mrb[8].mxu0 %v732_v2  ;;  %v792_v58 = vand.u32 4294901760, %v791_v55 }
  0x36   : > { %5117 = vmatprep.mubr.f32.mxu0 %v742_v13 }
  0x39   : > { %5118 = vmatmul.mubr.f32.gmra.mrb[10].mxu0 %v752_v19 }
  0x3a   : > { %5120 = vmatprep.mubr.f32.mxu0 %v762_v47 }
  0x3d   : > { %5121 = vmatmul.mubr.f32.gmra.mrb[12].mxu0 %v772_v54 }
  0x3e   : > { %5123 = vmatprep.mubr.f32.mxu0 %v782_v56 }
  0x41   : > { %5124 = vmatmul.mubr.f32.gmra.mrb[14].mxu0 %v792_v58 }
  0x42   : > { %5128 = vmatprep.mubr.f32.mxu0 %v6661_v11 }
  0x45   : > { %5129 = vmatmul.mubr.f32.vlgmr.msra.gmra.mrb[0].mxu0 %v6663_v12 }
  0x46   : > { %5153 = vmatpush3.msra.mxu0 %v6670_v16  ;;  %5131 = vmatprep.mubr.f32.mxu0 %v6672_v17 }
  0x47   : > { %5178 = vmatprep.subr.mxu0 %v6654_v5 }
  0x49   : > { %5132 = vmatmul.mubr.f32.gmra.mrb[2].mxu0 %v6674_v18 }
  0x4a   : > { %5134 = vmatprep.mubr.f32.mxu0 %v6685_v23 }
  0x4d   : > { %5135 = vmatmul.mubr.f32.gmra.mrb[4].mxu0 %v6697_v28 }
  0x4e   : > { %5137 = vmatprep.mubr.f32.mxu0 %v6719_v40 }
  0x51   : > { %5138 = vmatmul.mubr.f32.gmra.mrb[6].mxu0 %v6744_v60 }
  0x52   : > { %5140 = vmatprep.mubr.f32.mxu0 %v6749_v1 }
  0x55   : > { %5141 = vmatmul.mubr.f32.gmra.mrb[8].mxu0 %v6759_v7 }
  0x56   : > { %5143 = vmatprep.mubr.f32.mxu0 %v6761_v8 }
  0x59   : > { %5144 = vmatmul.mubr.f32.gmra.mrb[10].mxu0 %v6779_v37 }
  0x5a   : > { %5146 = vmatprep.mubr.f32.mxu0 %v6781_v38 }
  0x5d   : > { %5147 = vmatmul.mubr.f32.gmra.mrb[12].mxu0 %v6783_v41 }
  0x5e   : > { %5149 = vmatprep.mubr.f32.mxu0 %v6804_v53 }
  0x61   : > { %5150 = vmatmul.mubr.f32.gmra.mrb[14].mxu0 %v6818_v0 }
  0x62   : > { %5154 = vmatprep.mubr.f32.mxu0 %v6680_v21  ;;  %v6965_v21 = vld [vmem:[%s7787_s5] ss:$0 sm:$0xff] }
  0x65   : > { %5155 = vmatmul.mubr.f32.vlgmr.msra.gmra.mrb[0].mxu0 %v6683_v22 }
  0x66   : > { %5179 = vmatpush3.msra.mxu0 %v6654_v5  ;;  %5157 = vmatprep.mubr.f32.mxu0 %v6692_v26 }
  0x67   : > { %5204 = vmatprep.subr.mxu0 %v6689_v25 }
  0x69   : > { %5158 = vmatmul.mubr.f32.gmra.mrb[2].mxu0 %v6695_v27 }
  0x6a   : > { %5160 = vmatprep.mubr.f32.mxu0 %v6702_v31 }
  0x6d   : > { %5161 = vmatmul.mubr.f32.gmra.mrb[4].mxu0 %v6710_v36  ;;  %v1666_v36 = vld [vmem:[%s6646_s27 + $0x18] sm:$0xff] }
  0x6e   : > { %5163 = vmatprep.mubr.f32.mxu0 %v6734_v50  ;;  %v1665_v50 = vld [vmem:[%s6646_s27 + $0x10] sm:$0xff] }
  0x71   : > { %5164 = vmatmul.mubr.f32.gmra.mrb[6].mxu0 %v6757_v6 }
  0x72   : > { %5166 = vmatprep.mubr.f32.mxu0 %v6764_v9 }
  0x75   : > { %5167 = vmatmul.mubr.f32.gmra.mrb[8].mxu0 %v6773_v24  ;;  %v1668_v24 = vld [vmem:[%s6646_s27 + $0x28] sm:$0xff] }
  0x76   : > { %5169 = vmatprep.mubr.f32.mxu0 %v6776_v32 }
  0x79   : > { %5170 = vmatmul.mubr.f32.gmra.mrb[10].mxu0 %v6795_v48 }
  0x7a   : > { %5172 = vmatprep.mubr.f32.mxu0 %v6798_v49 }
  0x7d   : > { %5173 = vmatmul.mubr.f32.gmra.mrb[12].mxu0 %v6802_v52 }
  0x7e   : > { %5175 = vmatprep.mubr.f32.mxu0 %v6815_v62 }
  0x81   : > { %5176 = vmatmul.mubr.f32.gmra.mrb[14].mxu0 %v6825_v10 }
  0x82   : > { %5180 = vmatprep.mubr.f32.mxu0 %v640_v29 }
  0x85   : > { %5181 = vmatmul.mubr.f32.vlgmr.msra.gmra.mrb[0].mxu0 %v650_v30 }
  0x86   : > { %5205 = vmatpush3.msra.mxu0 %v6689_v25  ;;  %5183 = vmatprep.mubr.f32.mxu0 %v660_v34  ;;  %v1664_v25 = vld [vmem:[%s6646_s27 + $0x8] sm:$0xff] }
  0x87   : > { %5230 = vmatprep.subr.mxu0 %v6654_v5 }
  0x89   : > { %5184 = vmatmul.mubr.f32.gmra.mrb[2].mxu0 %v670_v35 }
  0x8a   : > { %5186 = vmatprep.mubr.f32.mxu0 %v680_v39 }
  0x8d   : > { %5187 = vmatmul.mubr.f32.gmra.mrb[4].mxu0 %v690_v45 }
  0x8e   : > { %5189 = vmatprep.mubr.f32.mxu0 %v700_v59 }
  0x91   : > { %5190 = vmatmul.mubr.f32.gmra.mrb[6].mxu0 %v710_v20 }
  0x92   : > { %5192 = vmatprep.mubr.f32.mxu0 %v720_v33 }
  0x95   : > { %5193 = vmatmul.mubr.f32.gmra.mrb[8].mxu0 %v730_v43  ;;  %v1667_v43 = vld [vmem:[%s6646_s27 + $0x20] sm:$0xff] }
  0x96   : > { %5195 = vmatprep.mubr.f32.mxu0 %v740_v44 }
  0x99   : > { %5196 = vmatmul.mubr.f32.gmra.mrb[10].mxu0 %v750_v57 }
  0x9a   : > { %5198 = vmatprep.mubr.f32.mxu0 %v760_v61 }
  0x9d   : > { %5199 = vmatmul.mubr.f32.gmra.mrb[12].mxu0 %v770_v4  ;;  %v1670_v4 = vld [vmem:[%s6646_s27 + $0x38] sm:$0xff] }
  0x9e   : > { %5201 = vmatprep.mubr.f32.mxu0 %v780_v15 }
  0xa1   : > { %5202 = vmatmul.mubr.f32.gmra.mrb[14].mxu0 %v790_v46 }
  0xa2   : > { %5206 = vmatprep.mubr.f32.mxu0 %v6661_v11 }
  0xa5   : > { %5207 = vmatmul.mubr.f32.vlgmr.msra.gmra.mrb[0].mxu0 %v6663_v12 }
  0xa6   : > { %5231 = vmatpush3.msra.mxu0 %v6654_v5  ;;  %5209 = vmatprep.mubr.f32.mxu0 %v6672_v17  ;;  %v6533_v5 = vmov 0.0|0.0  }
  0xa7   : > { %5922 = vmatprep.subr.bf16.mxu1 %v6533_v5 }
  0xa9   : > { %5210 = vmatmul.mubr.f32.gmra.mrb[2].mxu0 %v6674_v18 }
  0xaa   : > { %5212 = vmatprep.mubr.f32.mxu0 %v6685_v23 }
  0xad   : > { %5213 = vmatmul.mubr.f32.gmra.mrb[4].mxu0 %v6697_v28 }
  0xae   : > { %5215 = vmatprep.mubr.f32.mxu0 %v6719_v40 }
  0xb1   : > { %5216 = vmatmul.mubr.f32.gmra.mrb[6].mxu0 %v6744_v60 }
  0xb2   : > { %5218 = vmatprep.mubr.f32.mxu0 %v6749_v1 }
  0xb5   : > { %5219 = vmatmul.mubr.f32.gmra.mrb[8].mxu0 %v6759_v7 }
  0xb6   : > { %5221 = vmatprep.mubr.f32.mxu0 %v6761_v8 }
  0xb9   : > { %5222 = vmatmul.mubr.f32.gmra.mrb[10].mxu0 %v6779_v37 }
  0xba   : > { %5224 = vmatprep.mubr.f32.mxu0 %v6781_v38 }
  0xbd   : > { %5225 = vmatmul.mubr.f32.gmra.mrb[12].mxu0 %v6783_v41 }
  0xbe   : > { %5227 = vmatprep.mubr.f32.mxu0 %v6804_v53 }
  0xc1   : > { %5228 = vmatmul.mubr.f32.gmra.mrb[14].mxu0 %v6818_v0 }
  0xc2   : > { %5232 = vmatprep.mubr.f32.mxu0 %v6661_v11  ;;  %v7798_v11 = vmov 0.0  }
  0xc3   : > { %5288 = vmatprep.mubr.msk.f32.mxu1 %vm6534_vm2, %v7798_v11 }
  0xc5   : > { %5233 = vmatmul.mubr.f32.vlgmr.msra.gmra.mrb[0].mxu0 %v6663_v12  ;;  %v1695_v12 = vlaneseq }
  0xc6   : > { %5235 = vmatprep.mubr.f32.mxu0 %v6672_v17  ;;  %v6954_v17 = vld [vmem:[%s492_s20] ss:$0 sm:$0xff] }
  0xc7   : > { %v6947_v16 = vshrl.u32 %v1695_v12, 7 }
  0xc9   : > { %5236 = vmatmul.mubr.f32.gmra.mrb[2].mxu0 %v6674_v18  ;;  %vm1702_vm3 = vcmp.eq.s32.totalorder %v6947_v16, %v6954_v17  ;;  %v2355_v17 = vld [vmem:[%s7785_s3] sm:$0x7] (!%p4670_p6) }
  0xca   : > { %5238 = vmatprep.mubr.f32.mxu0 %v6685_v23  ;;  %v4666_v18 = vsel %vm1702_vm3, 1.0, %v7798_v11 }
  0xcb   : > { %v6967_v22 = vsub.f32 %v4666_v18, %v4666_v18 }
  0xcd   : > { %5239 = vmatmul.mubr.f32.gmra.mrb[4].mxu0 %v6697_v28  ;;  %v1663_v28 = vld [vmem:[%s6646_s27] sm:$0xff]  ;;  %v7797_v31 = vand.u32 4294901760, %v6967_v22 }
  0xce   : > { %5241 = vmatprep.mubr.f32.mxu0 %v6719_v40 }
  0xd1   : > { %5242 = vmatmul.mubr.f32.gmra.mrb[6].mxu0 %v6744_v60 }
  0xd2   : > { %5244 = vmatprep.mubr.f32.mxu0 %v6749_v1 }
  0xd5   : > { %5245 = vmatmul.mubr.f32.gmra.mrb[8].mxu0 %v6759_v7  ;;  %v6983_v7 = vsub.f32 %v6967_v22, %v7797_v31 }
  0xd6   : > { %5247 = vmatprep.mubr.f32.mxu0 %v6761_v8 }
  0xd9   : > { %5248 = vmatmul.mubr.f32.gmra.mrb[10].mxu0 %v6779_v37 }
  0xda   : > { %5250 = vmatprep.mubr.f32.mxu0 %v6781_v38 }
  0xdd   : > { %5251 = vmatmul.mubr.f32.gmra.mrb[12].mxu0 %v6783_v41 }
  0xde   : > { %5253 = vmatprep.mubr.f32.mxu0 %v6804_v53 }
  0xe1   : > { %5254 = vmatmul.mubr.f32.gmra.mrb[14].mxu0 %v6818_v0 }
 0x198   : > { %v5234_v23 = vpop.f32.mrb[0].mxu0 }
 0x199   : > { %v6354_v26 = vadd.f32 %v5234_v23, %v6965_v21  ;;  %v1569_v27 = vpop.f32.mrb[1].mxu0 }
 0x19a   : > { %v6355_v29 = vadd.f32 %v6965_v21, %v1569_v27 }
 0x19b   : > { %v1680_v30 = vmul.f32 %v6354_v26, %v1664_v25 }
 0x19c   : > { %v1679_v34 = vmul.f32 %v6355_v29, %v1663_v28  ;;  %v5237_v35 = vpop.f32.mrb[2].mxu0  ;;  %v1672_v28 = vld [vmem:[%s6646_s27 + $0x48] sm:$0xff] }
 0x19d   : > { %v1710_v39 = vand.u32 4294901760, %v1680_v30  ;;  %v6356_v40 = vadd.f32 %v5237_v35, %v6965_v21  ;;  %v1581_v45 = vpop.f32.mrb[3].mxu0 }
 0x19e   : > { %v1707_v59 = vand.u32 4294901760, %v1679_v34  ;;  %v6357_v60 = vadd.f32 %v6965_v21, %v1581_v45 }
 0x19f   : > { %v6978_v1 = vsub.f32 %v1680_v30, %v1710_v39  ;;  %v1682_v6 = vmul.f32 %v6356_v40, %v1666_v36 }
 0x1a0   : > { %v6985_v8 = vsub.f32 %v1679_v34, %v1707_v59  ;;  %v1681_v9 = vmul.f32 %v6357_v60, %v1665_v50  ;;  %v5240_v20 = vpop.f32.mrb[4].mxu0  ;;  %v6988_v32 = vpack.c.bf16 %v1710_v39, %v1707_v59  ;;  %v1671_v39 = vld [vmem:[%s6646_s27 + $0x40] sm:$0xff] }
 0x1a1   : > { %v1807_v33 = vand.u32 4294901760, %v6978_v1  ;;  %v1716_v37 = vand.u32 4294901760, %v1682_v6  ;;  %v6358_v38 = vadd.f32 %v5240_v20, %v6965_v21  ;;  %v1593_v41 = vpop.f32.mrb[5].mxu0 }
 0x1a2   : > { %v1800_v44 = vand.u32 4294901760, %v6985_v8  ;;  %v1713_v48 = vand.u32 4294901760, %v1681_v9  ;;  %v6359_v49 = vadd.f32 %v6965_v21, %v1593_v41  ;;  %5924 = vmatpush3.bf16.msra.mxu1 %v6988_v32 }
 0x1a3   : > { %v1808_v53 = vsub.f32 %v6978_v1, %v1807_v33  ;;  %v7001_v57 = vsub.f32 %v1682_v6, %v1716_v37  ;;  %v1684_v61 = vmul.f32 %v6358_v38, %v1668_v24  ;;  %5925 = vmatprep.subr.bf16.mxu1 %v6533_v5 }
 0x1a4   : > { %v1801_v63 = vsub.f32 %v6985_v8, %v1800_v44  ;;  %v7008_v0 = vsub.f32 %v1681_v9, %v1713_v48  ;;  %v1683_v2 = vmul.f32 %v6359_v49, %v1667_v43  ;;  %v5243_v3 = vpop.f32.mrb[6].mxu0  ;;  %v7011_v10 = vpack.c.bf16 %v1716_v37, %v1713_v48  ;;  %v1674_v48 = vld [vmem:[%s6646_s27 + $0x58] sm:$0xff] }
 0x1a5   : > { %v1821_v13 = vand.u32 4294901760, %v7001_v57  ;;  %v1722_v14 = vand.u32 4294901760, %v1684_v61  ;;  %v6360_v15 = vadd.f32 %v5243_v3, %v6965_v21  ;;  %v1605_v19 = vpop.f32.mrb[7].mxu0  ;;  %v1809_v46 = vand.u32 4294901760, %v1808_v53  ;;  %v1673_v3 = vld [vmem:[%s6646_s27 + $0x50] sm:$0xff] }
 0x1a6   : > { %v1814_v47 = vand.u32 4294901760, %v7008_v0  ;;  %v1719_v51 = vand.u32 4294901760, %v1683_v2  ;;  %v6361_v54 = vadd.f32 %v6965_v21, %v1605_v19  ;;  %5927 = vmatpush3.bf16.msra.mxu1 %v7011_v10  ;;  %v1802_v55 = vand.u32 4294901760, %v1801_v63 }
 0x1a7   : > { %v1822_v56 = vsub.f32 %v7001_v57, %v1821_v13  ;;  %v7022_v58 = vsub.f32 %v1684_v61, %v1722_v14  ;;  %v1686_v12 = vmul.f32 %v6360_v15, %v1670_v4  ;;  %5928 = vmatprep.subr.bf16.mxu1 %v6533_v5 }
 0x1a8   : > { %v1815_v23 = vsub.f32 %v7008_v0, %v1814_v47  ;;  %v7030_v25 = vsub.f32 %v1683_v2, %v1719_v51  ;;  %v1685_v26 = vmul.f32 %v6361_v54, %v1669_v42  ;;  %v5246_v27 = vpop.f32.mrb[8].mxu0  ;;  %v7033_v29 = vpack.c.bf16 %v1722_v14, %v1719_v51 }
 0x1a9   : > { %v1835_v30 = vand.u32 4294901760, %v7022_v58  ;;  %v1728_v34 = vand.u32 4294901760, %v1686_v12  ;;  %v6362_v35 = vadd.f32 %v5246_v27, %v6965_v21  ;;  %v1617_v36 = vpop.f32.mrb[9].mxu0  ;;  %v7038_v40 = vpack.c.bf16 %v1809_v46, %v1802_v55  ;;  %v1676_v27 = vld [vmem:[%s6646_s27 + $0x68] sm:$0xff] }
 0x1aa   : > { %v1828_v45 = vand.u32 4294901760, %v7030_v25  ;;  %v1725_v50 = vand.u32 4294901760, %v1685_v26  ;;  %v6363_v59 = vadd.f32 %v6965_v21, %v1617_v36  ;;  %5930 = vmatpush3.bf16.msra.mxu1 %v7033_v29  ;;  %v1816_v60 = vand.u32 4294901760, %v1815_v23 }
 0x1ab   : > { %v1836_v6 = vsub.f32 %v7022_v58, %v1835_v30  ;;  %v7046_v9 = vsub.f32 %v1686_v12, %v1728_v34  ;;  %v1688_v20 = vmul.f32 %v6362_v35, %v1672_v28  ;;  %5931 = vmatprep.subr.bf16.mxu1 %v6533_v5  ;;  %v1823_v24 = vand.u32 4294901760, %v1822_v56 }
 0x1ac   : > { %v1829_v37 = vsub.f32 %v7030_v25, %v1828_v45  ;;  %v7052_v38 = vsub.f32 %v1685_v26, %v1725_v50  ;;  %v1687_v41 = vmul.f32 %v6363_v59, %v1671_v39  ;;  %v5249_v43 = vpop.f32.mrb[10].mxu0  ;;  %v7055_v49 = vpack.c.bf16 %v1728_v34, %v1725_v50  ;;  %v1675_v50 = vld [vmem:[%s6646_s27 + $0x60] sm:$0xff] }
 0x1ad   : > { %v1849_v53 = vand.u32 4294901760, %v7046_v9  ;;  %v1734_v61 = vand.u32 4294901760, %v1688_v20  ;;  %v6364_v63 = vadd.f32 %v5249_v43, %v6965_v21  ;;  %v1629_v2 = vpop.f32.mrb[11].mxu0  ;;  %v7060_v4 = vpack.c.bf16 %v1823_v24, %v1816_v60 }
 0x1ae   : > { %v1842_v14 = vand.u32 4294901760, %v7052_v38  ;;  %v1731_v15 = vand.u32 4294901760, %v1687_v41  ;;  %v6365_v19 = vadd.f32 %v6965_v21, %v1629_v2  ;;  %5933 = vmatpush3.bf16.msra.mxu1 %v7055_v49  ;;  %v1830_v42 = vand.u32 4294901760, %v1829_v37 }
 0x1af   : > { %v1850_v46 = vsub.f32 %v7046_v9, %v1849_v53  ;;  %v7068_v51 = vsub.f32 %v1688_v20, %v1734_v61  ;;  %v1690_v54 = vmul.f32 %v6364_v63, %v1674_v48  ;;  %5934 = vmatprep.subr.bf16.mxu1 %v6533_v5  ;;  %v1837_v55 = vand.u32 4294901760, %v1836_v6 }
 0x1b0   : > { %v1843_v56 = vsub.f32 %v7052_v38, %v1842_v14  ;;  %v7074_v12 = vsub.f32 %v1687_v41, %v1731_v15  ;;  %v1689_v23 = vmul.f32 %v6365_v19, %v1673_v3  ;;  %v5252_v26 = vpop.f32.mrb[12].mxu0  ;;  %v7077_v28 = vpack.c.bf16 %v1734_v61, %v1731_v15  ;;  %v1678_v15 = vld [vmem:[%s6646_s27 + $0x78] sm:$0xff] }
 0x1b1   : > { %v7800_v34 = vand.u32 4294901760, %v7068_v51  ;;  %v1740_v35 = vand.u32 4294901760, %v1690_v54  ;;  %v6366_v36 = vadd.f32 %v5252_v26, %v6965_v21  ;;  %v1641_v39 = vpop.f32.mrb[13].mxu0  ;;  %v7082_v59 = vpack.c.bf16 %v1837_v55, %v1830_v42  ;;  %v1677_v26 = vld [vmem:[%s6646_s27 + $0x70] sm:$0xff] }
 0x1b2   : > { %v7801_v60 = vand.u32 4294901760, %v7074_v12  ;;  %v1737_v6 = vand.u32 4294901760, %v1689_v23  ;;  %v6367_v20 = vadd.f32 %v6965_v21, %v1641_v39  ;;  %5936 = vmatpush3.bf16.msra.mxu1 %v7077_v28  ;;  %v1844_v24 = vand.u32 4294901760, %v1843_v56 }
 0x1b3   : > { %v1864_v37 = vsub.f32 %v7068_v51, %v7800_v34  ;;  %v7090_v41 = vsub.f32 %v1690_v54, %v1740_v35  ;;  %v1692_v43 = vmul.f32 %v6366_v36, %v1676_v27  ;;  %5937 = vmatprep.subr.bf16.mxu1 %v6533_v5  ;;  %v1851_v48 = vand.u32 4294901760, %v1850_v46 }
 0x1b4   : > { %v1857_v61 = vsub.f32 %v7074_v12, %v7801_v60  ;;  %v7096_v63 = vsub.f32 %v1689_v23, %v1737_v6  ;;  %v1691_v2 = vmul.f32 %v6367_v20, %v1675_v50  ;;  %v5255_v3 = vpop.f32.mrb[14].mxu0  ;;  %v7099_v19 = vpack.c.bf16 %v1740_v35, %v1737_v6 }
 0x1b5   : > { %v1877_v42 = vand.u32 4294901760, %v7090_v41  ;;  %v1746_v55 = vand.u32 4294901760, %v1692_v43  ;;  %v6368_v54 = vadd.f32 %v5255_v3, %v6965_v21  ;;  %v1653_v56 = vpop.f32.mrb[15].mxu0  ;;  %v7104_v27 = vpack.c.bf16 %v1851_v48, %v1844_v24 }
 0x1b6   : > { %v1870_v46 = vand.u32 4294901760, %v7096_v63  ;;  %v1743_v36 = vand.u32 4294901760, %v1691_v2  ;;  %v6369_v23 = vadd.f32 %v6965_v21, %v1653_v56  ;;  %5939 = vmatpush3.bf16.msra.mxu1 %v7099_v19  ;;  %v1858_v39 = vand.u32 4294901760, %v1857_v61 }
 0x1b7   : > { %v1878_v35 = vsub.f32 %v7090_v41, %v1877_v42  ;;  %v7110_v50 = vsub.f32 %v1692_v43, %v1746_v55  ;;  %v1694_v6 = vmul.f32 %v6368_v54, %v1678_v15  ;;  %5940 = vmatprep.subr.bf16.mxu1 %v6533_v5  ;;  %v1865_v20 = vand.u32 4294901760, %v1864_v37 }
 0x1b8   : > { %v1871_v3 = vsub.f32 %v7096_v63, %v1870_v46  ;;  %v7114_v24 = vsub.f32 %v1691_v2, %v1743_v36  ;;  %v1693_v48 = vmul.f32 %v6369_v23, %v1677_v26  ;;  %v7116_v31 = vpack.c.bf16 %v1746_v55, %v1743_v36 }
 0x1b9   : > { %v1891_v21 = vand.u32 4294901760, %v7110_v50  ;;  %v1752_v56 = vand.u32 4294901760, %v1694_v6  ;;  %v5959_v18 = vpack.c.bf16 %v1865_v20, %v1858_v39  ;;  %v1879_v61 = vand.u32 4294901760, %v1878_v35 }
 0x1ba   : > { %v1884_v52 = vand.u32 4294901760, %v7114_v24  ;;  %v1749_v43 = vand.u32 4294901760, %v1693_v48  ;;  %5942 = vmatpush3.bf16.msra.mxu1 %v7116_v31  ;;  %v1872_v15 = vand.u32 4294901760, %v1871_v3  ;;  %v5977_v37 = vpack.c.bf16 %v7022_v58, %v7030_v25 }
 0x1bb   : > { %v1892_v2 = vsub.f32 %v7110_v50, %v1891_v21  ;;  %v7124_v54 = vsub.f32 %v1694_v6, %v1752_v56  ;;  %5943 = vmatprep.subr.bf16.mxu1 %v6533_v5  ;;  %v5980_v55 = vpack.c.bf16 %v7046_v9, %v7052_v38  ;;  %v5983_v26 = vpack.c.bf16 %v7068_v51, %v7074_v12 }
 0x1bc   : > { %v1885_v36 = vsub.f32 %v7114_v24, %v1884_v52  ;;  %v1897_v23 = vsub.f32 %v1693_v48, %v1749_v43  ;;  %v7132_v39 = vpack.c.bf16 %v1752_v56, %v1749_v43  ;;  %v5962_v35 = vpack.c.bf16 %v1879_v61, %v1872_v15  ;;  %v2366_v15 = vld [vmem:[%s7788_s6 + $0x20] sm:$0xff] (!%p4670_p6) }
 0x1bd   : > { %v1905_v20 = vand.u32 4294901760, %v7124_v54  ;;  %v1893_v3 = vand.u32 4294901760, %v1892_v2  ;;  %v5986_v6 = vpack.c.bf16 %v7090_v41, %v7096_v63  ;;  %v5989_v11 = vpack.c.bf16 %v7110_v50, %v7114_v24 }
 0x1be   : > { %v1898_v62 = vand.u32 4294901760, %v1897_v23  ;;  %5945 = vmatpush3.bf16.msra.mxu1 %v7132_v39  ;;  %v1886_v34 = vand.u32 4294901760, %v1885_v36  ;;  %v5992_v60 = vpack.c.bf16 %v7124_v54, %v1897_v23  ;;  %v7145_v48 = vpack.c.bf16 %v1807_v33, %v1800_v44 }
 0x1bf   : > { %v1906_v56 = vsub.f32 %v7124_v54, %v1905_v20  ;;  %5946 = vmatprep.subr.bf16.mxu1 %v6533_v5  ;;  %v7153_v41 = vpack.c.bf16 %v1821_v13, %v1814_v47  ;;  %v7159_v63 = vpack.c.bf16 %v1835_v30, %v1828_v45  ;;  %v7165_v33 = vpack.c.bf16 %v1849_v53, %v1842_v14  ;;  %v1705_v14 = vld [vmem:[#allocation2] sm:$0x7] }
 0x1c0   : > { %v1899_v44 = vsub.f32 %v1897_v23, %v1898_v62  ;;  %v5965_v50 = vpack.c.bf16 %v1893_v3, %v1886_v34  ;;  %v7802_v24 = vand.u32 4294901760, %v7074_v12  ;;  %v7803_v61 = vand.u32 4294901760, %v7068_v51  ;;  %v2362_v34 = vld [vmem:[%s7788_s6] sm:$0xff] (!%p4670_p6) }
 0x1c1   : > { %v7173_v47 = vpack.c.bf16 %v1877_v42, %v1870_v46  ;;  %v7804_v58 = vand.u32 4294901760, %v6983_v7  ;;  %v1907_v25 = vand.u32 4294901760, %v1906_v56  ;;  %v7177_v30 = vpack.c.bf16 %v1891_v21, %v1884_v52  ;;  %v2364_v46 = vld [vmem:[%s7788_s6 + $0x10] sm:$0xff] (!%p4670_p6)  ;;  %v2365_v21 = vld [vmem:[%s7788_s6 + $0x18] sm:$0xff] (!%p4670_p6) }
 0x1c2   : > { %v7171_v13 = vpack.c.bf16 %v7803_v61, %v7802_v24  ;;  %v7179_v45 = vpack.c.bf16 %v1905_v20, %v1898_v62  ;;  %v1900_v9 = vand.u32 4294901760, %v1899_v44  ;;  %v7805_v38 = vmov 0.0   ;;  %v2369_v20 = vld [vmem:[%s7788_s6 + $0x38] sm:$0xff] (!%p4670_p6) }
 0x1c3   : > { %5289 = vmatmul.mubr.f32.vlgmr.msra.gmra.mrb[0].mxu1 %v7804_v58  ;;  %v6536_v7 = vmov 1.0   ;;  %v7806_v52 = vpack.c.bf16 %v6978_v1, %v6985_v8  ;;  %v7807_v62 = vpack.c.bf16 %v7001_v57, %v7008_v0  ;;  %v2382_v42 = vand.u32 (!%p4670_p6), 4294901760, %v2362_v34 }
 0x1c4   : > { %5948 = vmatpush3.bf16.msra.mxu1 %v7038_v40  ;;  %5323 = vmatprep.mubr.msk.f32.mxu1 %vm6534_vm2, %v7805_v38  ;;  %v5968_v53 = vpack.c.bf16 %v1907_v25, %v1900_v9  ;;  %v2388_v43 = vand.u32 (!%p4670_p6), 4294901760, %v2364_v46  ;;  %v2394_v23 = vand.u32 (!%p4670_p6), 4294901760, %v2366_v15  ;;  %v6540_v44 = vmov (!%p4670_p6), 0.0  }
 0x1c5   : > { %5949 = vmatprep.subr.bf16.mxu1 %v6533_v5  ;;  %v7305_v54 = vsub.f32 (!%p4670_p6), %v2362_v34, %v2382_v42  ;;  %5482 = vmatprep.mubr.msk.f32.mxu0 (!%p4670_p6), %vm6539_vm5, %v6540_v44 }
 0x1c6   : > { %v7319_v3 = vsub.f32 (!%p4670_p6), %v2364_v46, %v2388_v43 }
 0x1c8   : > { %5951 = vmatpush3.bf16.msra.mxu1 %v7060_v4  ;;  %v2481_v25 = vand.u32 (!%p4670_p6), 4294901760, %v7319_v3 }
 0x1c9   : > { %5952 = vmatprep.subr.bf16.mxu1 %v6533_v5 }
 0x1cc   : > { %5954 = vmatpush3.bf16.msra.mxu1 %v7082_v59  ;;  %v2363_v59 = vld [vmem:[%s7788_s6 + $0x8] sm:$0xff] (!%p4670_p6) }
 0x1cd   : > { %5955 = vmatprep.subr.bf16.mxu1 %v6533_v5 }
 0x1d0   : > { %5957 = vmatpush3.bf16.msra.mxu1 %v7104_v27  ;;  %v2385_v27 = vand.u32 (!%p4670_p6), 4294901760, %v2363_v59 }
 0x1d1   : > { %5958 = vmatprep.subr.bf16.mxu1 %v6533_v5 }
 0x1d2   : > { %v7303_v2 = vpack.c.bf16 (!%p4670_p6), %v2385_v27, %v2382_v42 }
 0x1d4   : > { %5960 = vmatpush3.bf16.msra.mxu1 %v5959_v18 }
 0x1d5   : > { %5961 = vmatprep.subr.bf16.mxu1 %v6533_v5 }
 0x1d8   : > { %5963 = vmatpush3.bf16.msra.mxu1 %v5962_v35  ;;  %v2368_v35 = vld [vmem:[%s7788_s6 + $0x30] sm:$0xff] (!%p4670_p6) }
 0x1d9   : > { %5964 = vmatprep.subr.bf16.mxu1 %v6533_v5 }
 0x1dc   : > { %5966 = vmatpush3.bf16.msra.mxu1 %v5965_v50  ;;  %v2467_v50 = vand.u32 (!%p4670_p6), 4294901760, %v7305_v54 }
 0x1dd   : > { %5967 = vmatprep.subr.bf16.mxu1 %v6533_v5 }
 0x1e0   : > { %5969 = vmatpush3.bf16.msra.mxu1 %v5968_v53  ;;  %v2482_v53 = vsub.f32 (!%p4670_p6), %v7319_v3, %v2481_v25 }
 0x1e1   : > { %5970 = vmatprep.subr.bf16.mxu1 %v6533_v5 }
 0x1e3   : > { %5324 = vmatmul.mubr.msk.f32.vlgmr.msra.gmra.mrb[2].mxu1 %vm1702_vm3, %v6536_v7 }
 0x1e4   : > { %5972 = vmatpush3.bf16.msra.mxu1 %v7806_v52  ;;  %5358 = vmatprep.mubr.msk.f32.mxu1 %vm6534_vm2, %v7805_v38 }
 0x1e5   : > { %5973 = vmatprep.subr.bf16.mxu1 %v6533_v5 }
 0x1e8   : > { %5975 = vmatpush3.bf16.msra.mxu1 %v7807_v62  ;;  %v2483_v62 = vand.u32 (!%p4670_p6), 4294901760, %v2482_v53 }
 0x1e9   : > { %5976 = vmatprep.subr.bf16.mxu1 %v6533_v5 }
 0x1ec   : > { %5978 = vmatpush3.bf16.msra.mxu1 %v5977_v37  ;;  %v2367_v37 = vld [vmem:[%s7788_s6 + $0x28] sm:$0xff] (!%p4670_p6) }
 0x1ed   : > { %5979 = vmatprep.subr.bf16.mxu1 %v6533_v5 }
 0x1f0   : > { %5981 = vmatpush3.bf16.msra.mxu1 %v5980_v55  ;;  %v7307_v55 = vsub.f32 (!%p4670_p6), %v2363_v59, %v2385_v27 }
 0x1f1   : > { %5982 = vmatprep.subr.bf16.mxu1 %v6533_v5 }
 0x1f2   : > { %v2474_v24 = vand.u32 (!%p4670_p6), 4294901760, %v7307_v55 }
 0x1f4   : > { %5984 = vmatpush3.bf16.msra.mxu1 %v5983_v26  ;;  %v2391_v26 = vand.u32 (!%p4670_p6), 4294901760, %v2365_v21  ;;  %v2475_v58 = vsub.f32 (!%p4670_p6), %v7307_v55, %v2474_v24 }
 0x1f5   : > { %5985 = vmatprep.subr.bf16.mxu1 %v6533_v5 }
 0x1f6   : > { %v7310_v36 = vpack.c.bf16 (!%p4670_p6), %v2391_v26, %v2388_v43 }
 0x1f8   : > { %5987 = vmatpush3.bf16.msra.mxu1 %v5986_v6  ;;  %v7321_v6 = vsub.f32 (!%p4670_p6), %v2365_v21, %v2391_v26  ;;  %v2926_v26 = vld [vmem:[%s7790_s8 + $0x8] sm:$0xff] (!%p4670_p6) }
 0x1f9   : > { %5988 = vmatprep.subr.bf16.mxu1 %v6533_v5 }
 0x1fc   : > { %5990 = vmatpush3.bf16.msra.mxu1 %v5989_v11  ;;  %v7808_v11 = vand.u32 4294901760, %v6967_v22 }
 0x1fd   : > { %5991 = vmatprep.subr.bf16.mxu1 %v6533_v5 }
 0x200   : > { %5993 = vmatpush3.bf16.msra.mxu1 %v5992_v60  ;;  %v6537_v60 = vmov (!%p4670_p6), 0  }
 0x201   : > { %5994 = vmatprep.subr.bf16.mxu1 %v6533_v5  ;;  %6511 = vset.pattern.permute.xlu0 (!%p4670_p6), %v6537_v60 }
 0x202   : > { %2358 = vperm.xlu0 (!%p4670_p6), %6511, %v2355_v17   ;;  %v6115_v17 = vpack.c.bf16 (!%p4670_p6), %v2474_v24, %v2467_v50 }
 0x203   : > { %5359 = vmatmul.mubr.f32.vlgmr.msra.gmra.mrb[4].mxu1 %v6967_v22 }
 0x204   : > { %5996 = vmatpush3.bf16.msra.mxu1 %v6988_v32  ;;  %5393 = vmatprep.mubr.msk.f32.mxu1 %vm6534_vm2, %v7805_v38 }
 0x205   : > { %5997 = vmatprep.subr.bf16.mxu1 %v6533_v5 }
 0x208   : > { %5999 = vmatpush3.bf16.msra.mxu1 %v7011_v10 }
 0x209   : > { %6000 = vmatprep.subr.bf16.mxu1 %v6533_v5 }
 0x20c   : > { %6002 = vmatpush3.bf16.msra.mxu1 %v7033_v29 }
 0x20d   : > { %6003 = vmatprep.subr.bf16.mxu1 %v6533_v5 }
 0x210   : > { %6005 = vmatpush3.bf16.msra.mxu1 %v7055_v49 }
 0x211   : > { %6006 = vmatprep.subr.bf16.mxu1 %v6533_v5 }
 0x214   : > { %6008 = vmatpush3.bf16.msra.mxu1 %v7077_v28 }
 0x215   : > { %6009 = vmatprep.subr.bf16.mxu1 %v6533_v5 }
 0x218   : > { %6011 = vmatpush3.bf16.msra.mxu1 %v7099_v19 }
 0x219   : > { %6012 = vmatprep.subr.bf16.mxu1 %v6533_v5 }
 0x21c   : > { %6014 = vmatpush3.bf16.msra.mxu1 %v7116_v31 }
 0x21d   : > { %6015 = vmatprep.subr.bf16.mxu1 %v6533_v5 }
 0x220   : > { %6017 = vmatpush3.bf16.msra.mxu1 %v7132_v39 }
 0x221   : > { %6018 = vmatprep.subr.bf16.mxu1 %v6533_v5 }
 0x223   : > { %5394 = vmatmul.mubr.f32.vlgmr.msra.gmra.mrb[6].mxu1 %v7808_v11 }
 0x224   : > { %6020 = vmatpush3.bf16.msra.mxu1 %v7145_v48  ;;  %5428 = vmatprep.mubr.msk.f32.mxu1 %vm6534_vm2, %v7805_v38  ;;  %v7323_v48 = vsub.f32 (!%p4670_p6), %v2366_v15, %v2394_v23 }
 0x225   : > { %6021 = vmatprep.subr.bf16.mxu1 %v6533_v5 }
 0x228   : > { %6023 = vmatpush3.bf16.msra.mxu1 %v7153_v41  ;;  %v2400_v41 = vand.u32 (!%p4670_p6), 4294901760, %v2368_v35 }
 0x229   : > { %6024 = vmatprep.subr.bf16.mxu1 %v6533_v5 }
 0x22a   : > { %v7335_v61 = vsub.f32 (!%p4670_p6), %v2368_v35, %v2400_v41  ;;  %v2927_v35 = vld [vmem:[%s7790_s8 + $0x10] sm:$0xff] (!%p4670_p6) }
 0x22c   : > { %6026 = vmatpush3.bf16.msra.mxu1 %v7159_v63  ;;  %v2403_v63 = vand.u32 (!%p4670_p6), 4294901760, %v2369_v20 }
 0x22d   : > { %6027 = vmatprep.subr.bf16.mxu1 %v6533_v5 }
 0x230   : > { %6029 = vmatpush3.bf16.msra.mxu1 %v7165_v33 }
 0x231   : > { %6030 = vmatprep.subr.bf16.mxu1 %v6533_v5 }
 0x234   : > { %6032 = vmatpush3.bf16.msra.mxu1 %v7171_v13  ;;  %v7337_v13 = vsub.f32 (!%p4670_p6), %v2369_v20, %v2403_v63  ;;  %v2928_v20 = vld [vmem:[%s7790_s8 + $0x18] sm:$0xff] (!%p4670_p6) }
 0x235   : > { %6033 = vmatprep.subr.bf16.mxu1 %v6533_v5 }
 0x238   : > { %6035 = vmatpush3.bf16.msra.mxu1 %v7173_v47  ;;  %v2468_v47 = vsub.f32 (!%p4670_p6), %v7305_v54, %v2467_v50 }
 0x239   : > { %6036 = vmatprep.subr.bf16.mxu1 %v6533_v5 }
 0x23a   : > { %v2469_v9 = vand.u32 (!%p4670_p6), 4294901760, %v2468_v47  ;;  %v2932_v47 = vld [vmem:[%s7790_s8 + $0x38] sm:$0xff] (!%p4670_p6) }
 0x23c   : > { %6038 = vmatpush3.bf16.msra.mxu1 %v7177_v30  ;;  %v2488_v30 = vand.u32 (!%p4670_p6), 4294901760, %v7321_v6 }
 0x23d   : > { %6039 = vmatprep.subr.bf16.mxu1 %v6533_v5 }
 0x23e   : > { %v6118_v34 = vpack.c.bf16 (!%p4670_p6), %v2488_v30, %v2481_v25 }
 0x240   : > { %6041 = vmatpush3.bf16.msra.mxu1 %v7179_v45  ;;  %v7346_v45 = vpack.c.bf16 (!%p4670_p6), %v2403_v63, %v2400_v41  ;;  %v2930_v41 = vld [vmem:[%s7790_s8 + $0x28] sm:$0xff] (!%p4670_p6) }
 0x241   : > { %6042 = vmatprep.subr.bf16.mxu1 %v6533_v5 }
 0x243   : > { %5429 = vmatmul.mubr.msk.f32.vlgmr.msra.gmra.mrb[8].mxu1 %vm1702_vm3, %v6536_v7 }
 0x244   : > { %6044 = vmatpush3.bf16.msra.mxu1 %v6988_v32  ;;  %5463 = vmatprep.mubr.msk.f32.mxu1 %vm6534_vm2, %v7805_v38  ;;  %v2476_v38 = vand.u32 (!%p4670_p6), 4294901760, %v2475_v58 }
 0x245   : > { %6045 = vmatprep.subr.bf16.mxu1 %v6533_v5 }
 0x246   : > { %v6079_v52 = vpack.c.bf16 (!%p4670_p6), %v2476_v38, %v2469_v9  ;;  %v2965_v38 = vand.u32 (!%p4670_p6), 4294901760, %v2932_v47 }
 0x248   : > { %6047 = vmatpush3.bf16.msra.mxu1 %v7011_v10 }
 0x249   : > { %6048 = vmatprep.subr.bf16.mxu1 %v6533_v5 }
 0x24c   : > { %6050 = vmatpush3.bf16.msra.mxu1 %v7033_v29 }
 0x24d   : > { %6051 = vmatprep.subr.bf16.mxu1 %v6533_v5 }
 0x250   : > { %6053 = vmatpush3.bf16.msra.mxu1 %v7055_v49 }
 0x251   : > { %6054 = vmatprep.subr.bf16.mxu1 %v6533_v5 }
 0x254   : > { %6056 = vmatpush3.bf16.msra.mxu1 %v7077_v28 }
 0x255   : > { %6057 = vmatprep.subr.bf16.mxu1 %v6533_v5 }
 0x258   : > { %6059 = vmatpush3.bf16.msra.mxu1 %v7099_v19  ;;  %v6538_v19 = vmov (!%p4670_p6), 0.0|0.0  }
 0x259   : > { %6060 = vmatprep.subr.bf16.mxu1 %v6533_v5  ;;  %6066 = vmatprep.subr.bf16.mxu0 (!%p4670_p6), %v6538_v19 }
 0x25a   : > { %6068 = vmatpush3.bf16.msra.mxu0 (!%p4670_p6), %v7303_v2 }
 0x25b   : > { %6069 = vmatprep.subr.bf16.mxu0 (!%p4670_p6), %v6538_v19 }
 0x25c   : > { %6062 = vmatpush3.bf16.msra.mxu1 %v7116_v31 }
 0x25d   : > { %6063 = vmatprep.subr.bf16.mxu1 %v6533_v5 }
 0x25e   : > { %6071 = vmatpush3.bf16.msra.mxu0 (!%p4670_p6), %v7310_v36 }
 0x25f   : > { %6072 = vmatprep.subr.bf16.mxu0 (!%p4670_p6), %v6538_v19 }
 0x260   : > { %6065 = vmatpush3.bf16.msra.mxu1 %v7132_v39  ;;  %v2397_v39 = vand.u32 (!%p4670_p6), 4294901760, %v2367_v37 }
 0x261   : > { %6138 = vmatprep.subr.bf16.mxu1 (!%p4670_p6), %v6538_v19 }
 0x262   : > { %v7325_v56 = vsub.f32 (!%p4670_p6), %v2367_v37, %v2397_v39  ;;  %v7328_v33 = vpack.c.bf16 (!%p4670_p6), %v2397_v39, %v2394_v23  ;;  %v2947_v23 = vand.u32 (!%p4670_p6), 4294901760, %v2926_v26 }
 0x263   : > { %5464 = vmatmul.mubr.msk.f32.vlgmr.msra.gmra.mrb[10].mxu1 %vm1702_vm3, %v6536_v7  ;;  %v2489_v7 = vsub.f32 (!%p4670_p6), %v7321_v6, %v2488_v30 }
 0x264   : > { %5596 = vmatprep.mubr.msk.f32.mxu1 (!%p4670_p6), %vm6539_vm5, %v6540_v44  ;;  %6074 = vmatpush3.bf16.msra.mxu0 (!%p4670_p6), %v7328_v33  ;;  %v7438_v24 = vsub.f32 (!%p4670_p6), %v2926_v26, %v2947_v23 }
 0x265   : > { %6075 = vmatprep.subr.bf16.mxu0 (!%p4670_p6), %v6538_v19  ;;  %v2490_v11 = vand.u32 (!%p4670_p6), 4294901760, %v2489_v7 }
 0x266   : > { %v3036_v7 = vand.u32 (!%p4670_p6), 4294901760, %v7438_v24 }
 0x268   : > { %6077 = vmatpush3.bf16.msra.mxu0 (!%p4670_p6), %v7346_v45 }
 0x269   : > { %6078 = vmatprep.subr.bf16.mxu0 (!%p4670_p6), %v6538_v19 }
 0x281   : > { %v2359_v27 = vpop.permute.xlu0 (!%p4670_p6), %2358 }
 0x296   : > { %v1793_v22 = vpop.f32.mrb[0].mxu1 }
 0x297   : > { %v5290_v1 = vpop.f32.mrb[1].mxu1 }
 0x298   : > { %v2502_v1 = vand.u32 (!%p4670_p6), 4294901760, %v7325_v56 }
 0x2b6   : > { %v1944_v8 = vpop.f32.mrb[2].mxu1 }
 0x2b7   : > { %v1945_v32 = vadd.f32 %v1944_v8, %v1793_v22  ;;  %v5325_v57 = vpop.f32.mrb[3].mxu1  ;;  %v2495_v22 = vand.u32 (!%p4670_p6), 4294901760, %v7323_v48  ;;  %v6082_v8 = vpack.c.bf16 (!%p4670_p6), %v2490_v11, %v2483_v62  ;;  %v7464_v11 = vsub.f32 (!%p4670_p6), %v2932_v47, %v2965_v38 }
 0x2b8   : > { %v2503_v57 = vsub.f32 (!%p4670_p6), %v7325_v56, %v2502_v1 }
 0x2b9   : > { %v6121_v59 = vpack.c.bf16 (!%p4670_p6), %v2502_v1, %v2495_v22  ;;  %v3037_v1 = vsub.f32 (!%p4670_p6), %v7438_v24, %v3036_v7 }
 0x2d6   : > { %v2048_v0 = vpop.f32.mrb[4].mxu1 }
 0x2d7   : > { %v2049_v10 = vadd.f32 %v2048_v0, %v1945_v32  ;;  %v5360_v18 = vpop.f32.mrb[5].mxu1  ;;  %v2496_v32 = vsub.f32 (!%p4670_p6), %v7323_v48, %v2495_v22 }
 0x2d8   : > { %v2509_v18 = vand.u32 (!%p4670_p6), 4294901760, %v7335_v61 }
 0x2d9   : > { %v2497_v0 = vand.u32 (!%p4670_p6), 4294901760, %v2496_v32 }
 0x2f6   : > { %v2137_v29 = vpop.f32.mrb[6].mxu1 }
 0x2f7   : > { %v2138_v40 = vadd.f32 %v2137_v29, %v2049_v10  ;;  %v5395_v31 = vpop.f32.mrb[7].mxu1  ;;  %v2504_v10 = vand.u32 (!%p4670_p6), 4294901760, %v2503_v57  ;;  %v2516_v29 = vand.u32 (!%p4670_p6), 4294901760, %v7337_v13 }
 0x2f8   : > { %v2510_v31 = vsub.f32 (!%p4670_p6), %v7335_v61, %v2509_v18 }
 0x2f9   : > { %v6124_v60 = vpack.c.bf16 (!%p4670_p6), %v2516_v29, %v2509_v18 }
 0x316   : > { %v2256_v49 = vpop.f32.mrb[8].mxu1 }
 0x317   : > { %v2257_v5 = vadd.f32 %v2256_v49, %v2138_v40  ;;  %v5430_v4 = vpop.f32.mrb[9].mxu1  ;;  %v6085_v40 = vpack.c.bf16 (!%p4670_p6), %v2504_v10, %v2497_v0  ;;  %v2517_v49 = vsub.f32 (!%p4670_p6), %v7337_v13, %v2516_v29  ;;  %v3038_v0 = vand.u32 (!%p4670_p6), 4294901760, %v3037_v1 }
 0x319   : > { %v2518_v4 = vand.u32 (!%p4670_p6), 4294901760, %v2517_v49 }
 0x335   : > { %2353 = sbr.rel (%p4670_p6) target bundleno = 2142 (0x85e), region = 84 }
 0x336   : > { %v2343_v51 = vpop.f32.mrb[10].mxu1 }
 0x337   : > { %v2344_v12 = vadd.f32 %v2343_v51, %v2257_v5  ;;  %v5465_v28 = vpop.f32.mrb[11].mxu1  ;;  %v2511_v5 = vand.u32 (!%p4670_p6), 4294901760, %v2510_v31  ;;  %v6091_v51 = vpack.c.bf16 (!%p4670_p6), %v7307_v55, %v7305_v54 }
 0x338   : > { %v6097_v28 = vpack.c.bf16 (!%p4670_p6), %v7325_v56, %v7323_v48  ;;  %v2929_v56 = vld [vmem:[%s7790_s8 + $0x20] sm:$0xff] (!%p4670_p6) }
 0x339   : > { %v2347_v16 = vadd.f32 %v2344_v12, %v1705_v14  ;;  %v6088_v14 = vpack.c.bf16 (!%p4670_p6), %v2518_v4, %v2511_v5  ;;  %v6094_v12 = vpack.c.bf16 (!%p4670_p6), %v7321_v6, %v7319_v3  ;;  %v2950_v3 = vand.u32 (!%p4670_p6), 4294901760, %v2927_v35 }
 0x33a   : > { %v2953_v6 = vand.u32 (!%p4670_p6), 4294901760, %v2928_v20  ;;  %v2956_v63 = vand.u32 (!%p4670_p6), 4294901760, %v2929_v56 }
 0x33b   : > { %2349 = vst.msk [vmem:[#allocation2] sm:$0x7] %vm2348_vm4, %v2347_v16  ;;  %v6100_v16 = vpack.c.bf16 (!%p4670_p6), %v7337_v13, %v7335_v61  ;;  %v2931_v13 = vld [vmem:[%s7790_s8 + $0x30] sm:$0xff] (!%p4670_p6)  ;;  %v7448_v58 = vsub.f32 (!%p4670_p6), %v2927_v35, %v2950_v3 }
 0x33c   : > { %v7426_v48 = vpack.c.bf16 %v2953_v6, %v2950_v3  ;;  %v7450_v25 = vsub.f32 %v2928_v20, %v2953_v6  ;;  %v7453_v30 = vsub.f32 %v2929_v56, %v2956_v63  ;;  %v2962_v9 = vand.u32 4294901760, %v2931_v13 }
 0x33d   : > { %v3043_v32 = vand.u32 4294901760, %v7448_v58 }
 0x33e   : > { %v7462_v62 = vsub.f32 %v2931_v13, %v2962_v9  ;;  %v3050_v57 = vand.u32 4294901760, %v7450_v25  ;;  %v3057_v49 = vand.u32 4294901760, %v7453_v30 }
 0x33f   : > { %v3044_v10 = vsub.f32 %v7448_v58, %v3043_v32 }
 0x340   : > { %v3051_v18 = vsub.f32 %v7450_v25, %v3050_v57 }
 0x342   : > { %v2354_v42 = vld [vmem:[#allocation2] sm:$0x7]  ;;  %v3052_v31 = vand.u32 4294901760, %v3051_v18 }
 0x343   : > { %v2361_v46 = vmul.f32 %v2359_v27, %v2354_v42 }
 0x345   : > { %v2379_v21 = vsel %vm2377_vm6, %v2361_v46, 0 }
 0x346   : > { %v2454_v43 = vand.u32 4294901760, %v2379_v21 }
 0x348   : > { %v2455_v15 = vsub.f32 %v2379_v21, %v2454_v43 }
 0x34a   : > { %v2456_v37 = vand.u32 4294901760, %v2455_v15 }
 0x34c   : > { %v2457_v54 = vsub.f32 %v2455_v15, %v2456_v37 }
 0x34e   : > { %v2458_v55 = vand.u32 4294901760, %v2457_v54 }
 0x350   : > { %5483 = vmatmul.mubr.f32.vlgmr.msra.gmra.mrb[0].mxu0 %v2458_v55  ;;  %v6190_v55 = vpack.c.bf16 %v3050_v57, %v3043_v32  ;;  %v3493_v57 = vld [vmem:[%s7792_s10 + $0x30] sm:$0xff] }
 0x351   : > { %6080 = vmatpush3.bf16.msra.mxu0 %v6079_v52  ;;  %5501 = vmatprep.mubr.msk.f32.mxu0 %vm6539_vm5, %v6540_v44  ;;  %v7460_v52 = vpack.c.bf16 %v2965_v38, %v2962_v9  ;;  %v3490_v9 = vld [vmem:[%s7792_s10 + $0x18] sm:$0xff] }
 0x352   : > { %6081 = vmatprep.subr.bf16.mxu0 %v6538_v19 }
 0x355   : > { %6083 = vmatpush3.bf16.msra.mxu0 %v6082_v8 }
 0x356   : > { %6084 = vmatprep.subr.bf16.mxu0 %v6538_v19 }
 0x359   : > { %6086 = vmatpush3.bf16.msra.mxu0 %v6085_v40  ;;  %v3045_v40 = vand.u32 4294901760, %v3044_v10 }
 0x35a   : > { %6087 = vmatprep.subr.bf16.mxu0 %v6538_v19 }
 0x35b   : > { %v6154_v4 = vpack.c.bf16 %v3052_v31, %v3045_v40  ;;  %v3524_v31 = vand.u32 4294901760, %v3493_v57 }
 0x35d   : > { %6089 = vmatpush3.bf16.msra.mxu0 %v6088_v14  ;;  %v3058_v14 = vsub.f32 %v7453_v30, %v3057_v49 }
 0x35e   : > { %6090 = vmatprep.subr.bf16.mxu0 %v6538_v19 }
 0x360   : > { %5502 = vmatmul.mubr.f32.vlgmr.msra.gmra.mrb[0].mxu0 %v2454_v43 }
 0x361   : > { %6092 = vmatpush3.bf16.msra.mxu0 %v6091_v51  ;;  %5520 = vmatprep.mubr.msk.f32.mxu0 %vm6539_vm5, %v6540_v44 }
 0x362   : > { %6093 = vmatprep.subr.bf16.mxu0 %v6538_v19 }
 0x365   : > { %6095 = vmatpush3.bf16.msra.mxu0 %v6094_v12  ;;  %v3059_v12 = vand.u32 4294901760, %v3058_v14 }
 0x366   : > { %6096 = vmatprep.subr.bf16.mxu0 %v6538_v19 }
 0x369   : > { %6098 = vmatpush3.bf16.msra.mxu0 %v6097_v28 }
 0x36a   : > { %6099 = vmatprep.subr.bf16.mxu0 %v6538_v19 }
 0x36d   : > { %6101 = vmatpush3.bf16.msra.mxu0 %v6100_v16  ;;  %v3071_v16 = vand.u32 4294901760, %v7462_v62 }
 0x36e   : > { %6102 = vmatprep.subr.bf16.mxu0 %v6538_v19 }
 0x370   : > { %5521 = vmatmul.mubr.f32.vlgmr.msra.gmra.mrb[0].mxu0 %v2455_v15 }
 0x371   : > { %6104 = vmatpush3.bf16.msra.mxu0 %v7303_v2  ;;  %5539 = vmatprep.mubr.msk.f32.mxu0 %vm6539_vm5, %v6540_v44 }
 0x372   : > { %6105 = vmatprep.subr.bf16.mxu0 %v6538_v19 }
 0x375   : > { %6107 = vmatpush3.bf16.msra.mxu0 %v7310_v36 }
 0x376   : > { %6108 = vmatprep.subr.bf16.mxu0 %v6538_v19 }
 0x379   : > { %6110 = vmatpush3.bf16.msra.mxu0 %v7328_v33 }
 0x37a   : > { %6111 = vmatprep.subr.bf16.mxu0 %v6538_v19 }
 0x37d   : > { %6113 = vmatpush3.bf16.msra.mxu0 %v7346_v45 }
 0x37e   : > { %6114 = vmatprep.subr.bf16.mxu0 %v6538_v19 }
 0x380   : > { %5540 = vmatmul.mubr.f32.vlgmr.msra.gmra.mrb[0].mxu0 %v2456_v37  ;;  %v6172_v37 = vpack.c.bf16 %v7464_v11, %v7462_v62 }
 0x381   : > { %6116 = vmatpush3.bf16.msra.mxu0 %v6115_v17  ;;  %5558 = vmatprep.mubr.msk.f32.mxu0 %vm6539_vm5, %v6540_v44  ;;  %v3078_v17 = vand.u32 4294901760, %v7464_v11 }
 0x382   : > { %6117 = vmatprep.subr.bf16.mxu0 %v6538_v19 }
 0x383   : > { %v6196_v26 = vpack.c.bf16 %v3078_v17, %v3071_v16 }
 0x385   : > { %6119 = vmatpush3.bf16.msra.mxu0 %v6118_v34 }
 0x386   : > { %6120 = vmatprep.subr.bf16.mxu0 %v6538_v19 }
 0x389   : > { %6122 = vmatpush3.bf16.msra.mxu0 %v6121_v59  ;;  %v3072_v59 = vsub.f32 %v7462_v62, %v3071_v16  ;;  %v3492_v62 = vld [vmem:[%s7792_s10 + $0x28] sm:$0xff] }
 0x38a   : > { %6123 = vmatprep.subr.bf16.mxu0 %v6538_v19 }
 0x38b   : > { %v3073_v42 = vand.u32 4294901760, %v3072_v59 }
 0x38d   : > { %6125 = vmatpush3.bf16.msra.mxu0 %v6124_v60  ;;  %v3079_v60 = vsub.f32 %v7464_v11, %v3078_v17 }
 0x38e   : > { %6126 = vmatprep.subr.bf16.mxu0 %v6538_v19 }
 0x38f   : > { %v3080_v27 = vand.u32 4294901760, %v3079_v60 }
 0x390   : > { %5559 = vmatmul.mubr.f32.vlgmr.msra.gmra.mrb[0].mxu0 %v2454_v43 }
 0x391   : > { %6128 = vmatpush3.bf16.msra.mxu0 %v7303_v2  ;;  %5577 = vmatprep.mubr.msk.f32.mxu0 %vm6539_vm5, %v6540_v44  ;;  %v2925_v2 = vld [vmem:[%s7790_s8] sm:$0xff]  ;;  %v6160_v46 = vpack.c.bf16 %v3080_v27, %v3073_v42 }
 0x392   : > { %6129 = vmatprep.subr.bf16.mxu0 %v6538_v19 }
 0x395   : > { %6131 = vmatpush3.bf16.msra.mxu0 %v7310_v36  ;;  %v2944_v36 = vand.u32 4294901760, %v2925_v2 }
 0x396   : > { %6132 = vmatprep.subr.bf16.mxu0 %v6538_v19 }
 0x397   : > { %v7416_v39 = vpack.c.bf16 %v2947_v23, %v2944_v36  ;;  %v7436_v50 = vsub.f32 %v2925_v2, %v2944_v36  ;;  %v4671_v36 = vld [vmem:[%s7789_s7] ss:$0 sm:$0xff] }
 0x399   : > { %6134 = vmatpush3.bf16.msra.mxu0 %v7328_v33  ;;  %6140 = vmatpush3.bf16.msra.mxu1 %v7416_v39  ;;  %v2959_v33 = vand.u32 4294901760, %v2930_v41  ;;  %v3029_v53 = vand.u32 4294901760, %v7436_v50  ;;  %v6163_v21 = vpack.c.bf16 %v7438_v24, %v7436_v50 }
 0x39a   : > { %6135 = vmatprep.subr.bf16.mxu0 %v6538_v19  ;;  %6141 = vmatprep.subr.bf16.mxu1 %v6538_v19 }
 0x39b   : > { %v7440_v61 = vpack.c.bf16 %v2959_v33, %v2956_v63  ;;  %v3030_v22 = vsub.f32 %v7436_v50, %v3029_v53  ;;  %v6187_v54 = vpack.c.bf16 %v3036_v7, %v3029_v53  ;;  %v3515_v53 = vand.u32 4294901760, %v3490_v9 }
 0x39d   : > { %6137 = vmatpush3.bf16.msra.mxu0 %v7346_v45  ;;  %6143 = vmatpush3.bf16.msra.mxu1 %v7426_v48  ;;  %v7455_v45 = vsub.f32 %v2930_v41, %v2959_v33  ;;  %v3031_v8 = vand.u32 4294901760, %v3030_v22  ;;  %v3521_v22 = vand.u32 4294901760, %v3492_v62  ;;  %v7574_v18 = vsub.f32 %v3490_v9, %v3515_v53 }
 0x39e   : > { %6210 = vmatprep.subr.bf16.mxu0 %v6538_v19  ;;  %6144 = vmatprep.subr.bf16.mxu1 %v6538_v19 }
 0x39f   : > { %v6151_v29 = vpack.c.bf16 %v3038_v0, %v3031_v8  ;;  %v3064_v5 = vand.u32 4294901760, %v7455_v45  ;;  %v6169_v15 = vpack.c.bf16 %v7455_v45, %v7453_v30  ;;  %v3494_v0 = vld [vmem:[%s7792_s10 + $0x38] sm:$0xff]  ;;  %v7579_v40 = vsub.f32 %v3492_v62, %v3521_v22 }
 0x3a0   : > { %5578 = vmatmul.mubr.f32.vlgmr.msra.gmra.mrb[0].mxu0 %v2454_v43  ;;  %v6166_v43 = vpack.c.bf16 %v7450_v25, %v7448_v58  ;;  %v3612_v59 = vand.u32 4294901760, %v7574_v18 }
 0x3a1   : > { %5710 = vmatprep.mubr.msk.f32.mxu0 %vm6539_vm5, %v6540_v44  ;;  %6146 = vmatpush3.bf16.msra.mxu1 %v7440_v61  ;;  %v3065_v51 = vsub.f32 %v7455_v45, %v3064_v5  ;;  %v6193_v2 = vpack.c.bf16 %v3064_v5, %v3057_v49  ;;  %v3489_v45 = vld [vmem:[%s7792_s10 + $0x10] sm:$0xff]  ;;  %v3527_v49 = vand.u32 4294901760, %v3494_v0 }
 0x3a2   : > { %6147 = vmatprep.subr.bf16.mxu1 %v6538_v19  ;;  %v3512_v38 = vand.u32 4294901760, %v3489_v45  ;;  %v3613_v27 = vsub.f32 %v7574_v18, %v3612_v59 }
 0x3a3   : > { %v3066_v28 = vand.u32 4294901760, %v3065_v51  ;;  %v7584_v14 = vpack.c.bf16 %v3527_v49, %v3524_v31  ;;  %v7586_v51 = vsub.f32 %v3493_v57, %v3524_v31  ;;  %v4052_v31 = vld [vmem:[%s7794_s12 + $0x18] sm:$0xff] }
 0x3a4   : > { %v7550_v7 = vpack.c.bf16 %v3515_v53, %v3512_v38  ;;  %v7572_v10 = vsub.f32 %v3489_v45, %v3512_v38 }
 0x3a5   : > { %6149 = vmatpush3.bf16.msra.mxu1 %v7460_v52  ;;  %v6157_v34 = vpack.c.bf16 %v3066_v28, %v3059_v12  ;;  %v7588_v12 = vsub.f32 %v3494_v0, %v3527_v49 }
 0x3a6   : > { %6150 = vmatprep.subr.bf16.mxu1 %v6538_v19 }
 0x473   : > { %v2914_v23 = vpop.f32.mrb[0].mxu0 }
 0x474   : > { %v6450_v35 = vadd.f32 %v4671_v36, %v2914_v23  ;;  %v5579_v20 = vpop.f32.mrb[1].mxu0  ;;  %v3633_v23 = vand.u32 4294901760, %v7586_v51 }
 0x476   : > { %v4672_v3 = vmul.f32 -1.442695, %v6450_v35 }
 0x478   : > { %6512 = vpow2.f32 %v4672_v3  ;;  %v3634_v3 = vsub.f32 %v7586_v51, %v3633_v23 }
 0x482   : > { %v6513_v6 = vpop.eup %6512 }
 0x483   : > { %v2921_v56 = vadd.f32 1.0, %v6513_v6 }
 0x485   : > { %6514 = vrcp.f32 %v2921_v56  ;;  %v3635_v56 = vand.u32 4294901760, %v3634_v3 }
 0x48f   : > { %v6515_v41 = vpop.eup %6514 }
 0x490   : > { %v2924_v63 = vmul.f32 %v6515_v41, %v6450_v35  ;;  %v3640_v35 = vand.u32 4294901760, %v7588_v12 }
 0x492   : > { %v2941_v33 = vsel %vm2377_vm6, %v2924_v63, 0  ;;  %v3641_v6 = vsub.f32 %v7588_v12, %v3640_v35 }
 0x493   : > { %v3016_v50 = vand.u32 4294901760, %v2941_v33 }
 0x494   : > { %v3642_v41 = vand.u32 4294901760, %v3641_v6 }
 0x495   : > { %v3017_v24 = vsub.f32 %v2941_v33, %v3016_v50 }
 0x496   : > { %v6232_v63 = vpack.c.bf16 %v3642_v41, %v3635_v56 }
 0x497   : > { %v3018_v13 = vand.u32 4294901760, %v3017_v24 }
 0x499   : > { %v3019_v47 = vsub.f32 %v3017_v24, %v3018_v13 }
 0x49b   : > { %v3020_v58 = vand.u32 4294901760, %v3019_v47 }
 0x49d   : > { %5597 = vmatmul.mubr.f32.vlgmr.msra.gmra.mrb[0].mxu1 %v3020_v58 }
 0x49e   : > { %6152 = vmatpush3.bf16.msra.mxu1 %v6151_v29  ;;  %5615 = vmatprep.mubr.msk.f32.mxu1 %vm6539_vm5, %v6540_v44 }
 0x49f   : > { %6153 = vmatprep.subr.bf16.mxu1 %v6538_v19 }
 0x4a2   : > { %6155 = vmatpush3.bf16.msra.mxu1 %v6154_v4 }
 0x4a3   : > { %6156 = vmatprep.subr.bf16.mxu1 %v6538_v19 }
 0x4a6   : > { %6158 = vmatpush3.bf16.msra.mxu1 %v6157_v34  ;;  %v3605_v34 = vand.u32 4294901760, %v7572_v10 }
 0x4a7   : > { %6159 = vmatprep.subr.bf16.mxu1 %v6538_v19 }
 0x4a8   : > { %v3606_v42 = vsub.f32 %v7572_v10, %v3605_v34  ;;  %v6262_v58 = vpack.c.bf16 %v3612_v59, %v3605_v34  ;;  %v4055_v59 = vld [vmem:[%s7794_s12 + $0x30] sm:$0xff] }
 0x4aa   : > { %6161 = vmatpush3.bf16.msra.mxu1 %v6160_v46 }
 0x4ab   : > { %6162 = vmatprep.subr.bf16.mxu1 %v6538_v19 }
 0x4ad   : > { %5616 = vmatmul.mubr.f32.vlgmr.msra.gmra.mrb[0].mxu1 %v3016_v50 }
 0x4ae   : > { %6164 = vmatpush3.bf16.msra.mxu1 %v6163_v21  ;;  %5634 = vmatprep.mubr.msk.f32.mxu1 %vm6539_vm5, %v6540_v44  ;;  %v3607_v21 = vand.u32 4294901760, %v3606_v42 }
 0x4af   : > { %6165 = vmatprep.subr.bf16.mxu1 %v6538_v19 }
 0x4b2   : > { %6167 = vmatpush3.bf16.msra.mxu1 %v6166_v43  ;;  %v3614_v43 = vand.u32 4294901760, %v3613_v27 }
 0x4b3   : > { %6168 = vmatprep.subr.bf16.mxu1 %v6538_v19 }
 0x4b6   : > { %6170 = vmatpush3.bf16.msra.mxu1 %v6169_v15 }
 0x4b7   : > { %6171 = vmatprep.subr.bf16.mxu1 %v6538_v19 }
 0x4ba   : > { %6173 = vmatpush3.bf16.msra.mxu1 %v6172_v37  ;;  %v3626_v37 = vand.u32 4294901760, %v7579_v40 }
 0x4bb   : > { %6174 = vmatprep.subr.bf16.mxu1 %v6538_v19 }
 0x4bd   : > { %5635 = vmatmul.mubr.f32.vlgmr.msra.gmra.mrb[0].mxu1 %v3017_v24 }
 0x4be   : > { %6176 = vmatpush3.bf16.msra.mxu1 %v7416_v39  ;;  %5653 = vmatprep.mubr.msk.f32.mxu1 %vm6539_vm5, %v6540_v44 }
 0x4bf   : > { %6177 = vmatprep.subr.bf16.mxu1 %v6538_v19 }
 0x4c2   : > { %6179 = vmatpush3.bf16.msra.mxu1 %v7426_v48 }
 0x4c3   : > { %6180 = vmatprep.subr.bf16.mxu1 %v6538_v19 }
 0x4c6   : > { %6182 = vmatpush3.bf16.msra.mxu1 %v7440_v61 }
 0x4c7   : > { %6183 = vmatprep.subr.bf16.mxu1 %v6538_v19 }
 0x4ca   : > { %6185 = vmatpush3.bf16.msra.mxu1 %v7460_v52 }
 0x4cb   : > { %6186 = vmatprep.subr.bf16.mxu1 %v6538_v19 }
 0x4cd   : > { %5654 = vmatmul.mubr.f32.vlgmr.msra.gmra.mrb[0].mxu1 %v3018_v13  ;;  %v6244_v13 = vpack.c.bf16 %v7588_v12, %v7586_v51  ;;  %v4054_v51 = vld [vmem:[%s7794_s12 + $0x28] sm:$0xff] }
 0x4ce   : > { %6188 = vmatpush3.bf16.msra.mxu1 %v6187_v54  ;;  %5672 = vmatprep.mubr.msk.f32.mxu1 %vm6539_vm5, %v6540_v44  ;;  %v6226_v54 = vpack.c.bf16 %v3614_v43, %v3607_v21  ;;  %v4086_v43 = vand.u32 4294901760, %v4055_v59 }
 0x4cf   : > { %6189 = vmatprep.subr.bf16.mxu1 %v6538_v19 }
 0x4d2   : > { %6191 = vmatpush3.bf16.msra.mxu1 %v6190_v55 }
 0x4d3   : > { %6192 = vmatprep.subr.bf16.mxu1 %v6538_v19 }
 0x4d6   : > { %6194 = vmatpush3.bf16.msra.mxu1 %v6193_v2  ;;  %v3627_v2 = vsub.f32 %v7579_v40, %v3626_v37 }
 0x4d7   : > { %6195 = vmatprep.subr.bf16.mxu1 %v6538_v19 }
 0x4d8   : > { %v3628_v36 = vand.u32 4294901760, %v3627_v2  ;;  %v7707_v2 = vsub.f32 %v4055_v59, %v4086_v43 }
 0x4da   : > { %6197 = vmatpush3.bf16.msra.mxu1 %v6196_v26 }
 0x4db   : > { %6198 = vmatprep.subr.bf16.mxu1 %v6538_v19 }
 0x4dd   : > { %5673 = vmatmul.mubr.f32.vlgmr.msra.gmra.mrb[0].mxu1 %v3016_v50 }
 0x4de   : > { %6200 = vmatpush3.bf16.msra.mxu1 %v7416_v39  ;;  %5691 = vmatprep.mubr.msk.f32.mxu1 %vm6539_vm5, %v6540_v44  ;;  %v3487_v39 = vld [vmem:[%s7792_s10] sm:$0xff] }
 0x4df   : > { %6201 = vmatprep.subr.bf16.mxu1 %v6538_v19  ;;  %v3506_v25 = vand.u32 4294901760, %v3487_v39 }
 0x4e1   : > { %v7560_v1 = vsub.f32 %v3487_v39, %v3506_v25 }
 0x4e2   : > { %6203 = vmatpush3.bf16.msra.mxu1 %v7426_v48  ;;  %v3488_v48 = vld [vmem:[%s7792_s10 + $0x8] sm:$0xff] }
 0x4e3   : > { %6204 = vmatprep.subr.bf16.mxu1 %v6538_v19  ;;  %v3591_v5 = vand.u32 4294901760, %v7560_v1 }
 0x4e5   : > { %v3592_v28 = vsub.f32 %v7560_v1, %v3591_v5 }
 0x4e6   : > { %6206 = vmatpush3.bf16.msra.mxu1 %v7440_v61  ;;  %v3509_v61 = vand.u32 4294901760, %v3488_v48 }
 0x4e7   : > { %6207 = vmatprep.subr.bf16.mxu1 %v6538_v19  ;;  %v3593_v17 = vand.u32 4294901760, %v3592_v28  ;;  %v4083_v28 = vand.u32 4294901760, %v4054_v51 }
 0x4e8   : > { %v7540_v30 = vpack.c.bf16 %v3509_v61, %v3506_v25  ;;  %v7562_v8 = vsub.f32 %v3488_v48, %v3509_v61  ;;  %v6268_v48 = vpack.c.bf16 %v3640_v35, %v3633_v23  ;;  %v4673_v25 = vld [vmem:[%s7791_s9] ss:$0 sm:$0xff] }
 0x4e9   : > { %v7700_v21 = vsub.f32 %v4054_v51, %v4083_v28 }
 0x4ea   : > { %6209 = vmatpush3.bf16.msra.mxu1 %v7460_v52  ;;  %6212 = vmatpush3.bf16.msra.mxu0 %v7540_v30  ;;  %v3491_v52 = vld [vmem:[%s7792_s10 + $0x20] sm:$0xff]  ;;  %v3598_v4 = vand.u32 4294901760, %v7562_v8  ;;  %v6235_v33 = vpack.c.bf16 %v7562_v8, %v7560_v1 }
 0x4eb   : > { %6282 = vmatprep.subr.bf16.mxu1 %v6538_v19  ;;  %6213 = vmatprep.subr.bf16.mxu0 %v6538_v19  ;;  %v3518_v11 = vand.u32 4294901760, %v3491_v52 }
 0x4ec   : > { %v3599_v16 = vsub.f32 %v7562_v8, %v3598_v4  ;;  %v6259_v47 = vpack.c.bf16 %v3598_v4, %v3591_v5  ;;  %v4077_v5 = vand.u32 4294901760, %v4052_v31 }
 0x4ed   : > { %5692 = vmatmul.mubr.f32.vlgmr.msra.gmra.mrb[0].mxu1 %v3016_v50  ;;  %v7564_v32 = vpack.c.bf16 %v3521_v22, %v3518_v11  ;;  %v7577_v29 = vsub.f32 %v3491_v52, %v3518_v11  ;;  %v6238_v50 = vpack.c.bf16 %v7574_v18, %v7572_v10  ;;  %v4050_v18 = vld [vmem:[%s7794_s12 + $0x8] sm:$0xff] }
 0x4ee   : > { %5824 = vmatprep.mubr.msk.f32.mxu1 %vm6539_vm5, %v6540_v44  ;;  %6215 = vmatpush3.bf16.msra.mxu0 %v7550_v7  ;;  %v3600_v60 = vand.u32 4294901760, %v3599_v16  ;;  %v7695_v27 = vsub.f32 %v4052_v31, %v4077_v5 }
 0x4ef   : > { %6216 = vmatprep.subr.bf16.mxu0 %v6538_v19  ;;  %v3619_v15 = vand.u32 4294901760, %v7577_v29  ;;  %v6241_v24 = vpack.c.bf16 %v7579_v40, %v7577_v29  ;;  %v4071_v40 = vand.u32 4294901760, %v4050_v18 }
 0x4f0   : > { %v6223_v46 = vpack.c.bf16 %v3600_v60, %v3593_v17  ;;  %v4056_v60 = vld [vmem:[%s7794_s12 + $0x38] sm:$0xff]  ;;  %v4174_v3 = vand.u32 4294901760, %v7695_v27 }
 0x4f1   : > { %v3620_v55 = vsub.f32 %v7577_v29, %v3619_v15  ;;  %v6265_v39 = vpack.c.bf16 %v3626_v37, %v3619_v15  ;;  %v7683_v17 = vsub.f32 %v4050_v18, %v4071_v40  ;;  %v4089_v15 = vand.u32 4294901760, %v4056_v60 }
 0x4f2   : > { %6218 = vmatpush3.bf16.msra.mxu0 %v7564_v32  ;;  %v4175_v41 = vsub.f32 %v7695_v27, %v4174_v3 }
 0x4f3   : > { %6219 = vmatprep.subr.bf16.mxu0 %v6538_v19  ;;  %v3621_v26 = vand.u32 4294901760, %v3620_v55  ;;  %v7705_v55 = vpack.c.bf16 %v4089_v15, %v4086_v43 }
 0x4f5   : > { %v6229_v20 = vpack.c.bf16 %v3628_v36, %v3621_v26  ;;  %v7709_v26 = vsub.f32 %v4056_v60, %v4089_v15 }
 0x4f6   : > { %6221 = vmatpush3.bf16.msra.mxu0 %v7584_v14 }
 0x4f7   : > { %6222 = vmatprep.subr.bf16.mxu0 %v6538_v19 }
 0x5c0   : > { %v3476_v61 = vpop.f32.mrb[0].mxu1 }
 0x5c1   : > { %v6451_v45 = vadd.f32 %v4673_v25, %v3476_v61  ;;  %v5693_v9 = vpop.f32.mrb[1].mxu1  ;;  %v4195_v61 = vand.u32 4294901760, %v7707_v2 }
 0x5c3   : > { %v4674_v38 = vmul.f32 -1.442695, %v6451_v45 }
 0x5c5   : > { %6516 = vpow2.f32 %v4674_v38  ;;  %v4196_v38 = vsub.f32 %v7707_v2, %v4195_v61 }
 0x5cf   : > { %v6517_v53 = vpop.eup %6516 }
 0x5d0   : > { %v3483_v52 = vadd.f32 1.0, %v6517_v53 }
 0x5d2   : > { %6518 = vrcp.f32 %v3483_v52  ;;  %v4197_v52 = vand.u32 4294901760, %v4196_v38 }
 0x5dc   : > { %v6519_v62 = vpop.eup %6518 }
 0x5dd   : > { %v3486_v11 = vmul.f32 %v6519_v62, %v6451_v45  ;;  %v4202_v45 = vand.u32 4294901760, %v7709_v26 }
 0x5df   : > { %v3503_v22 = vsel %vm2377_vm6, %v3486_v11, 0  ;;  %v4203_v53 = vsub.f32 %v7709_v26, %v4202_v45  ;;  %v6340_v18 = vpack.c.bf16 %v4202_v45, %v4195_v61 }
 0x5e0   : > { %v3578_v1 = vand.u32 4294901760, %v3503_v22 }
 0x5e1   : > { %v4204_v62 = vand.u32 4294901760, %v4203_v53 }
 0x5e2   : > { %v3579_v8 = vsub.f32 %v3503_v22, %v3578_v1 }
 0x5e3   : > { %v6304_v11 = vpack.c.bf16 %v4204_v62, %v4197_v52 }
 0x5e4   : > { %v3580_v57 = vand.u32 4294901760, %v3579_v8 }
 0x5e6   : > { %v3581_v0 = vsub.f32 %v3579_v8, %v3580_v57 }
 0x5e8   : > { %v3582_v10 = vand.u32 4294901760, %v3581_v0 }
 0x5ea   : > { %5711 = vmatmul.mubr.f32.vlgmr.msra.gmra.mrb[2].mxu0 %v3582_v10 }
 0x5eb   : > { %6224 = vmatpush3.bf16.msra.mxu0 %v6223_v46  ;;  %5729 = vmatprep.mubr.msk.f32.mxu0 %vm6539_vm5, %v6540_v44 }
 0x5ec   : > { %6225 = vmatprep.subr.bf16.mxu0 %v6538_v19 }
 0x5ef   : > { %6227 = vmatpush3.bf16.msra.mxu0 %v6226_v54  ;;  %v4160_v54 = vand.u32 4294901760, %v7683_v17 }
 0x5f0   : > { %6228 = vmatprep.subr.bf16.mxu0 %v6538_v19 }
 0x5f1   : > { %v4161_v23 = vsub.f32 %v7683_v17, %v4160_v54 }
 0x5f3   : > { %6230 = vmatpush3.bf16.msra.mxu0 %v6229_v20  ;;  %v4162_v6 = vand.u32 4294901760, %v4161_v23 }
 0x5f4   : > { %6231 = vmatprep.subr.bf16.mxu0 %v6538_v19 }
 0x5f7   : > { %6233 = vmatpush3.bf16.msra.mxu0 %v6232_v63 }
 0x5f8   : > { %6234 = vmatprep.subr.bf16.mxu0 %v6538_v19 }
 0x5fa   : > { %5730 = vmatmul.mubr.f32.vlgmr.msra.gmra.mrb[2].mxu0 %v3578_v1 }
 0x5fb   : > { %6236 = vmatpush3.bf16.msra.mxu0 %v6235_v33  ;;  %5748 = vmatprep.mubr.msk.f32.mxu0 %vm6539_vm5, %v6540_v44 }
 0x5fc   : > { %6237 = vmatprep.subr.bf16.mxu0 %v6538_v19 }
 0x5ff   : > { %6239 = vmatpush3.bf16.msra.mxu0 %v6238_v50  ;;  %v4176_v50 = vand.u32 4294901760, %v4175_v41 }
 0x600   : > { %6240 = vmatprep.subr.bf16.mxu0 %v6538_v19 }
 0x603   : > { %6242 = vmatpush3.bf16.msra.mxu0 %v6241_v24 }
 0x604   : > { %6243 = vmatprep.subr.bf16.mxu0 %v6538_v19 }
 0x607   : > { %6245 = vmatpush3.bf16.msra.mxu0 %v6244_v13  ;;  %v4188_v13 = vand.u32 4294901760, %v7700_v21 }
 0x608   : > { %6246 = vmatprep.subr.bf16.mxu0 %v6538_v19 }
 0x60a   : > { %5749 = vmatmul.mubr.f32.vlgmr.msra.gmra.mrb[2].mxu0 %v3579_v8 }
 0x60b   : > { %6248 = vmatpush3.bf16.msra.mxu0 %v7540_v30  ;;  %5767 = vmatprep.mubr.msk.f32.mxu0 %vm6539_vm5, %v6540_v44 }
 0x60c   : > { %6249 = vmatprep.subr.bf16.mxu0 %v6538_v19 }
 0x60f   : > { %6251 = vmatpush3.bf16.msra.mxu0 %v7550_v7 }
 0x610   : > { %6252 = vmatprep.subr.bf16.mxu0 %v6538_v19 }
 0x613   : > { %6254 = vmatpush3.bf16.msra.mxu0 %v7564_v32 }
 0x614   : > { %6255 = vmatprep.subr.bf16.mxu0 %v6538_v19 }
 0x617   : > { %6257 = vmatpush3.bf16.msra.mxu0 %v7584_v14 }
 0x618   : > { %6258 = vmatprep.subr.bf16.mxu0 %v6538_v19 }
 0x61a   : > { %5768 = vmatmul.mubr.f32.vlgmr.msra.gmra.mrb[2].mxu0 %v3580_v57  ;;  %v6316_v57 = vpack.c.bf16 %v7709_v26, %v7707_v2 }
 0x61b   : > { %6260 = vmatpush3.bf16.msra.mxu0 %v6259_v47  ;;  %5786 = vmatprep.mubr.msk.f32.mxu0 %vm6539_vm5, %v6540_v44 }
 0x61c   : > { %6261 = vmatprep.subr.bf16.mxu0 %v6538_v19 }
 0x61f   : > { %6263 = vmatpush3.bf16.msra.mxu0 %v6262_v58 }
 0x620   : > { %6264 = vmatprep.subr.bf16.mxu0 %v6538_v19 }
 0x623   : > { %6266 = vmatpush3.bf16.msra.mxu0 %v6265_v39  ;;  %v4189_v39 = vsub.f32 %v7700_v21, %v4188_v13 }
 0x624   : > { %6267 = vmatprep.subr.bf16.mxu0 %v6538_v19 }
 0x625   : > { %v4190_v25 = vand.u32 4294901760, %v4189_v39 }
 0x627   : > { %6269 = vmatpush3.bf16.msra.mxu0 %v6268_v48 }
 0x628   : > { %6270 = vmatprep.subr.bf16.mxu0 %v6538_v19 }
 0x62a   : > { %5787 = vmatmul.mubr.f32.vlgmr.msra.gmra.mrb[2].mxu0 %v3578_v1 }
 0x62b   : > { %6272 = vmatpush3.bf16.msra.mxu0 %v7540_v30  ;;  %5805 = vmatprep.mubr.msk.f32.mxu0 %vm6539_vm5, %v6540_v44  ;;  %v4049_v30 = vld [vmem:[%s7794_s12] sm:$0xff] }
 0x62c   : > { %6273 = vmatprep.subr.bf16.mxu0 %v6538_v19  ;;  %v4068_v29 = vand.u32 4294901760, %v4049_v30 }
 0x62e   : > { %v7681_v16 = vsub.f32 %v4049_v30, %v4068_v29 }
 0x62f   : > { %6275 = vmatpush3.bf16.msra.mxu0 %v7550_v7  ;;  %v7661_v7 = vpack.c.bf16 %v4071_v40, %v4068_v29  ;;  %v4675_v29 = vld [vmem:[%s7793_s11] ss:$0 sm:$0xff] }
 0x630   : > { %6276 = vmatprep.subr.bf16.mxu0 %v6538_v19  ;;  %v4153_v37 = vand.u32 4294901760, %v7681_v16  ;;  %v6307_v22 = vpack.c.bf16 %v7683_v17, %v7681_v16 }
 0x631   : > { %6284 = vmatpush3.bf16.msra.mxu1 %v7661_v7 }
 0x632   : > { %6285 = vmatprep.subr.bf16.mxu1 %v6538_v19  ;;  %v4154_v36 = vsub.f32 %v7681_v16, %v4153_v37  ;;  %v6331_v0 = vpack.c.bf16 %v4160_v54, %v4153_v37 }
 0x633   : > { %6278 = vmatpush3.bf16.msra.mxu0 %v7564_v32  ;;  %v4051_v32 = vld [vmem:[%s7794_s12 + $0x10] sm:$0xff] }
 0x634   : > { %6279 = vmatprep.subr.bf16.mxu0 %v6538_v19  ;;  %v4074_v49 = vand.u32 4294901760, %v4051_v32  ;;  %v4155_v35 = vand.u32 4294901760, %v4154_v36 }
 0x636   : > { %v7671_v4 = vpack.c.bf16 %v4077_v5, %v4074_v49  ;;  %v7693_v42 = vsub.f32 %v4051_v32, %v4074_v49  ;;  %v6295_v63 = vpack.c.bf16 %v4162_v6, %v4155_v35 }
 0x637   : > { %6281 = vmatpush3.bf16.msra.mxu0 %v7584_v14  ;;  %v4053_v14 = vld [vmem:[%s7794_s12 + $0x20] sm:$0xff] }
 0x638   : > { %6287 = vmatpush3.bf16.msra.mxu1 %v7671_v4  ;;  %v4080_v12 = vand.u32 4294901760, %v4053_v14  ;;  %v4167_v20 = vand.u32 4294901760, %v7693_v42 }
 0x639   : > { %6288 = vmatprep.subr.bf16.mxu1 %v6538_v19 }
 0x63a   : > { %5806 = vmatmul.mubr.f32.vlgmr.msra.gmra.mrb[2].mxu0 %v3578_v1  ;;  %v7685_v34 = vpack.c.bf16 %v4083_v28, %v4080_v12  ;;  %v7698_v46 = vsub.f32 %v4053_v14, %v4080_v12  ;;  %v4168_v56 = vsub.f32 %v7693_v42, %v4167_v20  ;;  %v6310_v1 = vpack.c.bf16 %v7695_v27, %v7693_v42  ;;  %v4677_v27 = vld [vmem:[#allocation3] ss:$0 sm:$0xff] }
 0x63b   : > { %v6334_v10 = vpack.c.bf16 %v4174_v3, %v4167_v20 }
 0x63c   : > { %6290 = vmatpush3.bf16.msra.mxu1 %v7685_v34  ;;  %v4169_v33 = vand.u32 4294901760, %v4168_v56  ;;  %v4181_v24 = vand.u32 4294901760, %v7698_v46  ;;  %v6313_v8 = vpack.c.bf16 %v7700_v21, %v7698_v46 }
 0x63d   : > { %6291 = vmatprep.subr.bf16.mxu1 %v6538_v19 }
 0x63e   : > { %v6298_v47 = vpack.c.bf16 %v4176_v50, %v4169_v33  ;;  %v4182_v58 = vsub.f32 %v7698_v46, %v4181_v24  ;;  %v6337_v30 = vpack.c.bf16 %v4188_v13, %v4181_v24 }
 0x640   : > { %6293 = vmatpush3.bf16.msra.mxu1 %v7705_v55  ;;  %v4183_v48 = vand.u32 4294901760, %v4182_v58 }
 0x641   : > { %6294 = vmatprep.subr.bf16.mxu1 %v6538_v19 }
 0x642   : > { %v6301_v9 = vpack.c.bf16 %v4190_v25, %v4183_v48 }
 0x70d   : > { %v4038_v40 = vpop.f32.mrb[2].mxu0 }
 0x70e   : > { %v6452_v32 = vadd.f32 %v4675_v29, %v4038_v40  ;;  %v5807_v31 = vpop.f32.mrb[3].mxu0 }
 0x710   : > { %v4676_v49 = vmul.f32 -1.442695, %v6452_v32 }
 0x712   : > { %6520 = vpow2.f32 %v4676_v49 }
 0x71c   : > { %v6521_v5 = vpop.eup %6520 }
 0x71d   : > { %v4045_v14 = vadd.f32 1.0, %v6521_v5 }
 0x71f   : > { %6522 = vrcp.f32 %v4045_v14 }
 0x729   : > { %v6523_v51 = vpop.eup %6522 }
 0x72a   : > { %v4048_v12 = vmul.f32 %v6523_v51, %v6452_v32 }
 0x72c   : > { %v4065_v28 = vsel %vm2377_vm6, %v4048_v12, 0 }
 0x72d   : > { %v4140_v16 = vand.u32 4294901760, %v4065_v28 }
 0x72f   : > { %v4141_v17 = vsub.f32 %v4065_v28, %v4140_v16 }
 0x731   : > { %v4142_v59 = vand.u32 4294901760, %v4141_v17 }
 0x733   : > { %v4143_v60 = vsub.f32 %v4141_v17, %v4142_v59 }
 0x735   : > { %v4144_v42 = vand.u32 4294901760, %v4143_v60 }
 0x737   : > { %5825 = vmatmul.mubr.f32.vlgmr.msra.gmra.mrb[2].mxu1 %v4144_v42 }
 0x738   : > { %6296 = vmatpush3.bf16.msra.mxu1 %v6295_v63  ;;  %5843 = vmatprep.mubr.msk.f32.mxu1 %vm6539_vm5, %v6540_v44 }
 0x739   : > { %6297 = vmatprep.subr.bf16.mxu1 %v6538_v19 }
 0x73c   : > { %6299 = vmatpush3.bf16.msra.mxu1 %v6298_v47 }
 0x73d   : > { %6300 = vmatprep.subr.bf16.mxu1 %v6538_v19 }
 0x740   : > { %6302 = vmatpush3.bf16.msra.mxu1 %v6301_v9 }
 0x741   : > { %6303 = vmatprep.subr.bf16.mxu1 %v6538_v19 }
 0x744   : > { %6305 = vmatpush3.bf16.msra.mxu1 %v6304_v11 }
 0x745   : > { %6306 = vmatprep.subr.bf16.mxu1 %v6538_v19 }
 0x747   : > { %5844 = vmatmul.mubr.f32.vlgmr.msra.gmra.mrb[2].mxu1 %v4140_v16 }
 0x748   : > { %6308 = vmatpush3.bf16.msra.mxu1 %v6307_v22  ;;  %5862 = vmatprep.mubr.msk.f32.mxu1 %vm6539_vm5, %v6540_v44 }
 0x749   : > { %6309 = vmatprep.subr.bf16.mxu1 %v6538_v19 }
 0x74c   : > { %6311 = vmatpush3.bf16.msra.mxu1 %v6310_v1 }
 0x74d   : > { %6312 = vmatprep.subr.bf16.mxu1 %v6538_v19 }
 0x750   : > { %6314 = vmatpush3.bf16.msra.mxu1 %v6313_v8 }
 0x751   : > { %6315 = vmatprep.subr.bf16.mxu1 %v6538_v19 }
 0x754   : > { %6317 = vmatpush3.bf16.msra.mxu1 %v6316_v57 }
 0x755   : > { %6318 = vmatprep.subr.bf16.mxu1 %v6538_v19 }
 0x757   : > { %5863 = vmatmul.mubr.f32.vlgmr.msra.gmra.mrb[2].mxu1 %v4141_v17 }
 0x758   : > { %6320 = vmatpush3.bf16.msra.mxu1 %v7661_v7  ;;  %5881 = vmatprep.mubr.msk.f32.mxu1 %vm6539_vm5, %v6540_v44 }
 0x759   : > { %6321 = vmatprep.subr.bf16.mxu1 %v6538_v19 }
 0x75c   : > { %6323 = vmatpush3.bf16.msra.mxu1 %v7671_v4 }
 0x75d   : > { %6324 = vmatprep.subr.bf16.mxu1 %v6538_v19 }
 0x760   : > { %6326 = vmatpush3.bf16.msra.mxu1 %v7685_v34 }
 0x761   : > { %6327 = vmatprep.subr.bf16.mxu1 %v6538_v19 }
 0x764   : > { %6329 = vmatpush3.bf16.msra.mxu1 %v7705_v55 }
 0x765   : > { %6330 = vmatprep.subr.bf16.mxu1 %v6538_v19 }
 0x767   : > { %5882 = vmatmul.mubr.f32.vlgmr.msra.gmra.mrb[2].mxu1 %v4142_v59 }
 0x768   : > { %6332 = vmatpush3.bf16.msra.mxu1 %v6331_v0  ;;  %5900 = vmatprep.mubr.msk.f32.mxu1 %vm6539_vm5, %v6540_v44 }
 0x769   : > { %6333 = vmatprep.subr.bf16.mxu1 %v6538_v19 }
 0x76c   : > { %6335 = vmatpush3.bf16.msra.mxu1 %v6334_v10 }
 0x76d   : > { %6336 = vmatprep.subr.bf16.mxu1 %v6538_v19 }
 0x770   : > { %6338 = vmatpush3.bf16.msra.mxu1 %v6337_v30 }
 0x771   : > { %6339 = vmatprep.subr.bf16.mxu1 %v6538_v19 }
 0x774   : > { %6341 = vmatpush3.bf16.msra.mxu1 %v6340_v18 }
 0x775   : > { %6342 = vmatprep.subr.bf16.mxu1 %v6538_v19 }
 0x777   : > { %5901 = vmatmul.mubr.f32.vlgmr.msra.gmra.mrb[2].mxu1 %v4140_v16 }
 0x778   : > { %6344 = vmatpush3.bf16.msra.mxu1 %v7661_v7  ;;  %5919 = vmatprep.mubr.msk.f32.mxu1 %vm6539_vm5, %v6540_v44 }
 0x779   : > { %6345 = vmatprep.subr.bf16.mxu1 %v6538_v19 }
 0x77c   : > { %6347 = vmatpush3.bf16.msra.mxu1 %v7671_v4 }
 0x77d   : > { %6348 = vmatprep.subr.bf16.mxu1 %v6538_v19 }
 0x780   : > { %6350 = vmatpush3.bf16.msra.mxu1 %v7685_v34 }
 0x781   : > { %6351 = vmatprep.subr.bf16.mxu1 %v6538_v19 }
 0x784   : > { %6353 = vmatpush3.bf16.msra.mxu1 %v7705_v55 }
 0x787   : > { %5920 = vmatmul.mubr.f32.vlgmr.msra.gmra.mrb[2].mxu1 %v4140_v16 }
 0x85a   : > { %v4600_v46 = vpop.f32.mrb[2].mxu1 }
 0x85b   : > { %v6453_v7 = vadd.f32 %v4677_v27, %v4600_v46  ;;  %v5921_v21 = vpop.f32.mrb[3].mxu1 }
 0x85d   : > { %4605 = vst.msk [vmem:[%s7796_s14] sm:$0x7] %vm4604_vm7, %v6453_v7 }
 0x85e PF: > { %s26_s15 = sadd.s32 1, %s6530_s15  }
 0x85f   : > { %p23_p7 = scmp.ge.s32.totalorder %s26_s15, 5  }
 0x861   :  { %25 = sbr.rel (!%p23_p7) target bundleno = 3 (0x3), region = 116 }

</bundles_post_ra>
